<compile_context>
chip_gen: v7x
topology: tpu7x:2x2x1
jax: 0.10.0
libtpu: 0.0.40
codegen_flags: <defaults>
</compile_context>

<pallas_src>
import math

import jax
import jax.numpy as jnp
from jax import lax
from jax.experimental import pallas as pl
from jax.experimental.pallas import tpu as pltpu


# ---------------------------------------------------------------------------
# Fused Pallas kernel: time-MLP + conv_in(+temb,+SiLU) + conv_out, per batch.
# ---------------------------------------------------------------------------
def _make_fused_kernel(B, C, H, W, E, F):
    HW = H * W
    HPAD = (H + 4) * W  # 2 zero rows above and below, flattened with W

    def kernel(tprojT_ref, w1T_ref, b1_ref, w2T_ref, b2_ref, wpT_ref, bp_ref,
               w_in_ref, b_in_ref, w_out_ref, b_out_ref, mask_ref,
               x_ref, o_ref, gpad1, xcol1, gpad2, xcol2):
        b = pl.program_id(0)

        # ---- timestep MLP (column-major so temb is already an (F,1) column) ----
        onehot = (lax.broadcasted_iota(jnp.int32, (1, B), 1) == b).astype(jnp.float32)
        tcol = jnp.sum(tprojT_ref[...] * onehot, axis=1, keepdims=True)        # (E, 1)
        h = jnp.dot(w1T_ref[...], tcol, preferred_element_type=jnp.float32) + b1_ref[...]
        h = h * jax.nn.sigmoid(h)                                              # SiLU
        h = jnp.dot(w2T_ref[...], h, preferred_element_type=jnp.float32) + b2_ref[...]
        h = h * jax.nn.sigmoid(h)                                              # SiLU
        temb = jnp.dot(wpT_ref[...], h, preferred_element_type=jnp.float32) + bp_ref[...]  # (F,1)

        mask_l = mask_ref[0:1, :]       # keep where output col w != 0     (for dx == 0)
        mask_r = mask_ref[1:2, :]       # keep where output col w != W-1   (for dx == 2)

        def conv3x3(x_cf, gpad_ref, xcol_ref, w2d_ref, cin):
            """x_cf: (cin, H*W) f32. Returns (cout, H*W) f32 (bias not added)."""
            # Zero-padded (in H) image, flattened to lanes: rows [2, 2+H) hold x.
            gpad_ref[...] = jnp.zeros_like(gpad_ref)
            gpad_ref[:, 2 * W:2 * W + HW] = x_cf
            # Build im2col rows directly from the padded scratch ref (static slices).
            for dy in range(3):
                for dx in range(3):
                    t = dy * 3 + dx
                    s = (dy + 1) * W + dx - 1          # static lane offset of this tap
                    tap = gpad_ref[:, s:s + HW]        # (cin, H*W), lane-dense
                    if dx == 0:
                        tap = tap * mask_l
                    elif dx == 2:
                        tap = tap * mask_r
                    xcol_ref[t * cin:(t + 1) * cin, :] = tap
            # One matmul per conv: (cout, 9*cin) x (9*cin, H*W) -> (cout, H*W)
            return jnp.dot(w2d_ref[...], xcol_ref[...],
                           preferred_element_type=jnp.float32)

        x_cf = x_ref[0, :, :].astype(jnp.float32)                              # (C, H*W)
        h1 = conv3x3(x_cf, gpad1, xcol1, w_in_ref, C) + b_in_ref[...] + temb   # (F, H*W)
        h1 = h1 * jax.nn.sigmoid(h1)                                           # SiLU
        out = conv3x3(h1, gpad2, xcol2, w_out_ref, F) + b_out_ref[...]         # (C, H*W)
        o_ref[0, :, :] = out.astype(o_ref.dtype)

    return kernel


def fused_forward(kp, x_nchw, timestep):
    B, C, H, W = x_nchw.shape
    E = kp["w1T"].shape[0]
    F = kp["wpT"].shape[0]
    HW = H * W

    # Free reshape: NCHW is already (B, C, H*W)-contiguous. No transposes, no jnp.pad.
    x_flat = x_nchw.reshape(B, C, HW).astype(jnp.float32)

    # Sinusoidal timestep embedding, built directly transposed: (E, B).
    half = E // 2
    freqs = jnp.exp(-math.log(10000.0) * jnp.arange(half, dtype=jnp.float32) / half)
    argsT = freqs[:, None] * timestep.astype(jnp.float32)[None, :]
    tprojT = jnp.concatenate([jnp.sin(argsT), jnp.cos(argsT)], axis=0)          # (E, B)

    # Edge masks for the flattened-W conv taps (left / right column wrap-around).
    wcol = jnp.arange(HW, dtype=jnp.int32) % W
    edge_mask = jnp.stack([wcol != 0, wcol != W - 1]).astype(jnp.float32)       # (2, H*W)

    def full(shape):
        return pl.BlockSpec(shape, lambda b: (0,) * len(shape))

    grid_spec = pltpu.PrefetchScalarGridSpec(
        num_scalar_prefetch=0,
        grid=(B,),
        in_specs=[
            full((E, B)),                       # tprojT
            full((E, E)), full((E, 1)),         # w1T, b1
            full((E, E)), full((E, 1)),         # w2T, b2
            full((F, E)), full((F, 1)),         # wpT, bp
            full((F, 9 * C)), full((F, 1)),     # conv_in weight (im2col), bias
            full((C, 9 * F)), full((C, 1)),     # conv_out weight (im2col), bias
            full((2, HW)),                      # edge masks
            pl.BlockSpec((1, C, HW), lambda b: (b, 0, 0)),   # x, per-batch block
        ],
        out_specs=pl.BlockSpec((1, C, HW), lambda b: (b, 0, 0)),
        scratch_shapes=[
            pltpu.VMEM((C, (H + 4) * W), jnp.float32),       # padded x     (conv_in)
            pltpu.VMEM((9 * C, HW), jnp.float32),            # im2col       (conv_in)
            pltpu.VMEM((F, (H + 4) * W), jnp.float32),       # padded h     (conv_out)
            pltpu.VMEM((9 * F, HW), jnp.float32),            # im2col       (conv_out)
        ],
    )

    out_flat = pl.pallas_call(
        _make_fused_kernel(B, C, H, W, E, F),
        out_shape=jax.ShapeDtypeStruct((B, C, HW), jnp.float32),
        grid_spec=grid_spec,
        compiler_params=pltpu.CompilerParams(dimension_semantics=("parallel",)),
    )(tprojT, kp["w1T"], kp["b1c"], kp["w2T"], kp["b2c"], kp["wpT"], kp["bpc"],
      kp["w_in2d"], kp["b_in_c"], kp["w_out2d"], kp["b_out_c"], edge_mask, x_flat)

    return out_flat.reshape(B, C, H, W)                                         # free reshape


_jit_fused_forward = jax.jit(fused_forward)


# ---------------------------------------------------------------------------
# Synthetic diffusers-style model + the wrapper
# ---------------------------------------------------------------------------
class TinyDiffuserModel:
    """Minimal UNet2DModel-like denoiser: returns {'sample': out_nchw}."""

    def __init__(self, params):
        self.p = params
        E = params["w1"].shape[0]
        F = params["wp"].shape[1]
        C = params["conv_in_w"].shape[2]
        # One-time host-side re-layout of weights into kernel-friendly shapes.
        self.kp = {
            "w1T": params["w1"].T, "b1c": params["b1"].reshape(E, 1),
            "w2T": params["w2"].T, "b2c": params["b2"].reshape(E, 1),
            "wpT": params["wp"].T, "bpc": params["bp"].reshape(F, 1),
            "w_in2d": jnp.transpose(params["conv_in_w"], (3, 0, 1, 2)).reshape(F, 9 * C),
            "b_in_c": params["conv_in_b"].reshape(F, 1),
            "w_out2d": jnp.transpose(params["conv_out_w"], (3, 0, 1, 2)).reshape(C, 9 * F),
            "b_out_c": params["conv_out_b"].reshape(C, 1),
        }

    def __call__(self, sample_nchw, timestep):
        return {"sample": _jit_fused_forward(self.kp, sample_nchw, timestep)}


class DiffuserModelWrapper:
    """JAX/Pallas equivalent of the PyTorch wrapper: forward(*args) -> model(*args)['sample']."""

    def __init__(self, model):
        self.model = model

    def __call__(self, *args):
        return self.model(*args)["sample"]


# ---------------------------------------------------------------------------
# Pure-JAX reference (for a correctness sanity check)
# ---------------------------------------------------------------------------
def timestep_embedding(timesteps, dim):
    half = dim // 2
    freqs = jnp.exp(-math.log(10000.0) * jnp.arange(half, dtype=jnp.float32) / half)
    args = timesteps.astype(jnp.float32)[:, None] * freqs[None, :]
    return jnp.concatenate([jnp.sin(args), jnp.cos(args)], axis=-1)


def reference_forward(params, x_nchw, timestep):
    p = params
    x = jnp.transpose(x_nchw, (0, 2, 3, 1)).astype(jnp.float32)
    t_proj = timestep_embedding(timestep, p["w1"].shape[0])
    h = jax.nn.silu(t_proj @ p["w1"] + p["b1"])
    h = jax.nn.silu(h @ p["w2"] + p["b2"])
    temb = h @ p["wp"] + p["bp"]

    def conv(x_, w, b):
        return lax.conv_general_dilated(
            x_, w, window_strides=(1, 1), padding="SAME",
            dimension_numbers=("NHWC", "HWIO", "NHWC")) + b

    h1 = jax.nn.silu(conv(x, p["conv_in_w"], p["conv_in_b"]) + temb[:, None, None, :])
    out = conv(h1, p["conv_out_w"], p["conv_out_b"])
    return jnp.transpose(out, (0, 3, 1, 2))


# ---------------------------------------------------------------------------
# Main
# ---------------------------------------------------------------------------
if __name__ == "__main__":
    B, C, H, W = 2, 4, 16, 16     # NCHW, as in PyTorch
    E, F = 32, 8                  # time-embedding dim, hidden conv channels

    keys = jax.random.split(jax.random.PRNGKey(0), 12)
    init = lambda k, shape: (0.1 * jax.random.normal(k, shape, jnp.float32))
    params = {
        "w1": init(keys[0], (E, E)), "b1": init(keys[1], (E,)),
        "w2": init(keys[2], (E, E)), "b2": init(keys[3], (E,)),
        "wp": init(keys[4], (E, F)), "bp": init(keys[5], (F,)),
        "conv_in_w": init(keys[6], (3, 3, C, F)), "conv_in_b": init(keys[7], (F,)),
        "conv_out_w": init(keys[8], (3, 3, F, C)), "conv_out_b": init(keys[9], (C,)),
    }

    x = jax.random.normal(keys[10], (B, C, H, W), jnp.float32)
    timestep = jnp.array([3.0, 7.0], dtype=jnp.float32)

    wrapper = DiffuserModelWrapper(TinyDiffuserModel(params))
    sample = wrapper(x, timestep)
    sample = jax.block_until_ready(sample)

    ref = reference_forward(params, x, timestep)
    assert sample.shape == (B, C, H, W)
    assert jnp.allclose(sample, ref, rtol=1e-4, atol=1e-4), "Pallas kernel mismatch vs reference"

    print("KERNEL_OK")
</pallas_src>

<mosaic_0001>
module attributes {stable_mosaic.version = 11 : i64} {
  func.func @kernel(%arg0: i32, %arg1: memref<32x2xf32, #tpu.memory_space<vmem>>, %arg2: memref<32x32xf32, #tpu.memory_space<vmem>>, %arg3: memref<32x1xf32, #tpu.memory_space<vmem>>, %arg4: memref<32x32xf32, #tpu.memory_space<vmem>>, %arg5: memref<32x1xf32, #tpu.memory_space<vmem>>, %arg6: memref<8x32xf32, #tpu.memory_space<vmem>>, %arg7: memref<8x1xf32, #tpu.memory_space<vmem>>, %arg8: memref<8x36xf32, #tpu.memory_space<vmem>>, %arg9: memref<8x1xf32, #tpu.memory_space<vmem>>, %arg10: memref<4x72xf32, #tpu.memory_space<vmem>>, %arg11: memref<4x1xf32, #tpu.memory_space<vmem>>, %arg12: memref<2x256xf32, #tpu.memory_space<vmem>>, %arg13: memref<1x4x256xf32, #tpu.memory_space<vmem>>, %arg14: memref<1x4x256xf32, #tpu.memory_space<vmem>>, %arg15: memref<4x320xf32, #tpu.memory_space<vmem>>, %arg16: memref<36x256xf32, #tpu.memory_space<vmem>>, %arg17: memref<8x320xf32, #tpu.memory_space<vmem>>, %arg18: memref<72x256xf32, #tpu.memory_space<vmem>>) attributes {dimension_semantics = [#tpu.dimension_semantics<parallel>], iteration_bounds = array<i64: 2>, scalar_prefetch = 0 : i64, scratch_operands = 4 : i64, tpu.core_type = #tpu.core_type<tc>, window_params = [{pipeline_mode = #tpu.pipeline_mode<synchronous>, transform_indices = @transform_0, window_bounds = array<i64: 32, 2>}, {pipeline_mode = #tpu.pipeline_mode<synchronous>, transform_indices = @transform_1, window_bounds = array<i64: 32, 32>}, {pipeline_mode = #tpu.pipeline_mode<synchronous>, transform_indices = @transform_2, window_bounds = array<i64: 32, 1>}, {pipeline_mode = #tpu.pipeline_mode<synchronous>, transform_indices = @transform_3, window_bounds = array<i64: 32, 32>}, {pipeline_mode = #tpu.pipeline_mode<synchronous>, transform_indices = @transform_4, window_bounds = array<i64: 32, 1>}, {pipeline_mode = #tpu.pipeline_mode<synchronous>, transform_indices = @transform_5, window_bounds = array<i64: 8, 32>}, {pipeline_mode = #tpu.pipeline_mode<synchronous>, transform_indices = @transform_6, window_bounds = array<i64: 8, 1>}, {pipeline_mode = #tpu.pipeline_mode<synchronous>, transform_indices = @transform_7, window_bounds = array<i64: 8, 36>}, {pipeline_mode = #tpu.pipeline_mode<synchronous>, transform_indices = @transform_8, window_bounds = array<i64: 8, 1>}, {pipeline_mode = #tpu.pipeline_mode<synchronous>, transform_indices = @transform_9, window_bounds = array<i64: 4, 72>}, {pipeline_mode = #tpu.pipeline_mode<synchronous>, transform_indices = @transform_10, window_bounds = array<i64: 4, 1>}, {pipeline_mode = #tpu.pipeline_mode<synchronous>, transform_indices = @transform_11, window_bounds = array<i64: 2, 256>}, {transform_indices = @transform_12, window_bounds = array<i64: 1, 4, 256>}, {transform_indices = @transform_13, window_bounds = array<i64: 1, 4, 256>}]} {
    %0 = tpu.iota {dimensions = array<i32: 1>} : vector<1x2xi32>
    %1 = vector.broadcast %arg0 : i32 to vector<1x2xi32>
    %2 = arith.cmpi eq, %0, %1 : vector<1x2xi32>
    %3 = arith.extui %2 : vector<1x2xi1> to vector<1x2xi32>
    %4 = arith.sitofp %3 : vector<1x2xi32> to vector<1x2xf32>
    %c0 = arith.constant 0 : index
    %c0_0 = arith.constant 0 : index
    %5 = vector.load %arg1[%c0, %c0_0] : memref<32x2xf32, #tpu.memory_space<vmem>>, vector<32x2xf32>
    %6 = vector.broadcast %4 : vector<1x2xf32> to vector<32x2xf32>
    %7 = arith.mulf %5, %6 : vector<32x2xf32>
    %cst = arith.constant dense<0.000000e+00> : vector<32xf32>
    %8 = vector.multi_reduction <add>, %7, %cst [1] : vector<32x2xf32> to vector<32xf32>
    %9 = vector.shape_cast %8 : vector<32xf32> to vector<32x1xf32>
    %c0_1 = arith.constant 0 : index
    %c0_2 = arith.constant 0 : index
    %10 = vector.load %arg2[%c0_1, %c0_2] : memref<32x32xf32, #tpu.memory_space<vmem>>, vector<32x32xf32>
    %cst_3 = arith.constant dense<0.000000e+00> : vector<32x1xf32>
    %11 = tpu.matmul %10, %9, %cst_3 {dimension_numbers = #tpu.dot_dimension_numbers<[1], [0], [0], [1], [0, 0, 1, 1], [], []>} : vector<32x32xf32>, vector<32x1xf32>, vector<32x1xf32> -> vector<32x1xf32>
    %c0_4 = arith.constant 0 : index
    %c0_5 = arith.constant 0 : index
    %12 = vector.load %arg3[%c0_4, %c0_5] : memref<32x1xf32, #tpu.memory_space<vmem>>, vector<32x1xf32>
    %13 = arith.addf %11, %12 : vector<32x1xf32>
    %14 = arith.negf %13 : vector<32x1xf32>
    %15 = math.exp %14 : vector<32x1xf32>
    %cst_6 = arith.constant 1.000000e+00 : f32
    %16 = vector.broadcast %cst_6 : f32 to vector<32x1xf32>
    %17 = arith.addf %16, %15 : vector<32x1xf32>
    %18 = arith.divf %16, %17 : vector<32x1xf32>
    %19 = arith.mulf %13, %18 : vector<32x1xf32>
    %c0_7 = arith.constant 0 : index
    %c0_8 = arith.constant 0 : index
    %20 = vector.load %arg4[%c0_7, %c0_8] : memref<32x32xf32, #tpu.memory_space<vmem>>, vector<32x32xf32>
    %cst_9 = arith.constant dense<0.000000e+00> : vector<32x1xf32>
    %21 = tpu.matmul %20, %19, %cst_9 {dimension_numbers = #tpu.dot_dimension_numbers<[1], [0], [0], [1], [0, 0, 1, 1], [], []>} : vector<32x32xf32>, vector<32x1xf32>, vector<32x1xf32> -> vector<32x1xf32>
    %c0_10 = arith.constant 0 : index
    %c0_11 = arith.constant 0 : index
    %22 = vector.load %arg5[%c0_10, %c0_11] : memref<32x1xf32, #tpu.memory_space<vmem>>, vector<32x1xf32>
    %23 = arith.addf %21, %22 : vector<32x1xf32>
    %24 = arith.negf %23 : vector<32x1xf32>
    %25 = math.exp %24 : vector<32x1xf32>
    %cst_12 = arith.constant 1.000000e+00 : f32
    %26 = vector.broadcast %cst_12 : f32 to vector<32x1xf32>
    %27 = arith.addf %26, %25 : vector<32x1xf32>
    %28 = arith.divf %26, %27 : vector<32x1xf32>
    %29 = arith.mulf %23, %28 : vector<32x1xf32>
    %c0_13 = arith.constant 0 : index
    %c0_14 = arith.constant 0 : index
    %30 = vector.load %arg6[%c0_13, %c0_14] : memref<8x32xf32, #tpu.memory_space<vmem>>, vector<8x32xf32>
    %cst_15 = arith.constant dense<0.000000e+00> : vector<8x1xf32>
    %31 = tpu.matmul %30, %29, %cst_15 {dimension_numbers = #tpu.dot_dimension_numbers<[1], [0], [0], [1], [0, 0, 1, 1], [], []>} : vector<8x32xf32>, vector<32x1xf32>, vector<8x1xf32> -> vector<8x1xf32>
    %c0_16 = arith.constant 0 : index
    %c0_17 = arith.constant 0 : index
    %32 = vector.load %arg7[%c0_16, %c0_17] : memref<8x1xf32, #tpu.memory_space<vmem>>, vector<8x1xf32>
    %33 = arith.addf %31, %32 : vector<8x1xf32>
    %c0_18 = arith.constant 0 : index
    %c0_19 = arith.constant 0 : index
    %34 = vector.load %arg12[%c0_18, %c0_19] : memref<2x256xf32, #tpu.memory_space<vmem>>, vector<1x256xf32>
    %c1 = arith.constant 1 : index
    %c0_20 = arith.constant 0 : index
    %35 = vector.load %arg12[%c1, %c0_20] : memref<2x256xf32, #tpu.memory_space<vmem>>, vector<1x256xf32>
    %c0_21 = arith.constant 0 : index
    %c0_22 = arith.constant 0 : index
    %c0_23 = arith.constant 0 : index
    %36 = vector.load %arg13[%c0_21, %c0_22, %c0_23] : memref<1x4x256xf32, #tpu.memory_space<vmem>>, vector<1x4x256xf32>
    %37 = vector.shape_cast %36 : vector<1x4x256xf32> to vector<4x256xf32>
    %cst_24 = arith.constant 0.000000e+00 : f32
    %38 = vector.broadcast %cst_24 : f32 to vector<4x320xf32>
    %c0_25 = arith.constant 0 : index
    %c0_26 = arith.constant 0 : index
    %39 = vector.load %arg15[%c0_25, %c0_26] : memref<4x320xf32, #tpu.memory_space<vmem>>, vector<4x320xf32>
    tpu.vector_store %arg15[%c0_25, %c0_26], %38 {strides = array<i32>} : memref<4x320xf32, #tpu.memory_space<vmem>>, vector<4x320xf32>,
    %c0_27 = arith.constant 0 : index
    %c32 = arith.constant 32 : index
    %40 = vector.load %arg15[%c0_27, %c32] : memref<4x320xf32, #tpu.memory_space<vmem>>, vector<4x256xf32>
    tpu.vector_store %arg15[%c0_27, %c32], %37 {strides = array<i32>} : memref<4x320xf32, #tpu.memory_space<vmem>>, vector<4x256xf32>,
    %c0_28 = arith.constant 0 : index
    %c15 = arith.constant 15 : index
    %41 = vector.load %arg15[%c0_28, %c15] : memref<4x320xf32, #tpu.memory_space<vmem>>, vector<4x256xf32>
    %42 = vector.broadcast %34 : vector<1x256xf32> to vector<4x256xf32>
    %43 = arith.mulf %41, %42 : vector<4x256xf32>
    %c0_29 = arith.constant 0 : index
    %c0_30 = arith.constant 0 : index
    %44 = vector.load %arg16[%c0_29, %c0_30] : memref<36x256xf32, #tpu.memory_space<vmem>>, vector<4x256xf32>
    tpu.vector_store %arg16[%c0_29, %c0_30], %43 {strides = array<i32>} : memref<36x256xf32, #tpu.memory_space<vmem>>, vector<4x256xf32>,
    %c0_31 = arith.constant 0 : index
    %c16 = arith.constant 16 : index
    %45 = vector.load %arg15[%c0_31, %c16] : memref<4x320xf32, #tpu.memory_space<vmem>>, vector<4x256xf32>
    %c4 = arith.constant 4 : index
    %c0_32 = arith.constant 0 : index
    %46 = vector.load %arg16[%c4, %c0_32] : memref<36x256xf32, #tpu.memory_space<vmem>>, vector<4x256xf32>
    tpu.vector_store %arg16[%c4, %c0_32], %45 {strides = array<i32>} : memref<36x256xf32, #tpu.memory_space<vmem>>, vector<4x256xf32>,
    %c0_33 = arith.constant 0 : index
    %c17 = arith.constant 17 : index
    %47 = vector.load %arg15[%c0_33, %c17] : memref<4x320xf32, #tpu.memory_space<vmem>>, vector<4x256xf32>
    %48 = vector.broadcast %35 : vector<1x256xf32> to vector<4x256xf32>
    %49 = arith.mulf %47, %48 : vector<4x256xf32>
    %c8 = arith.constant 8 : index
    %c0_34 = arith.constant 0 : index
    %50 = vector.load %arg16[%c8, %c0_34] : memref<36x256xf32, #tpu.memory_space<vmem>>, vector<4x256xf32>
    tpu.vector_store %arg16[%c8, %c0_34], %49 {strides = array<i32>} : memref<36x256xf32, #tpu.memory_space<vmem>>, vector<4x256xf32>,
    %c0_35 = arith.constant 0 : index
    %c31 = arith.constant 31 : index
    %51 = vector.load %arg15[%c0_35, %c31] : memref<4x320xf32, #tpu.memory_space<vmem>>, vector<4x256xf32>
    %52 = vector.broadcast %34 : vector<1x256xf32> to vector<4x256xf32>
    %53 = arith.mulf %51, %52 : vector<4x256xf32>
    %c12 = arith.constant 12 : index
    %c0_36 = arith.constant 0 : index
    %54 = vector.load %arg16[%c12, %c0_36] : memref<36x256xf32, #tpu.memory_space<vmem>>, vector<4x256xf32>
    tpu.vector_store %arg16[%c12, %c0_36], %53 {strides = array<i32>} : memref<36x256xf32, #tpu.memory_space<vmem>>, vector<4x256xf32>,
    %c0_37 = arith.constant 0 : index
    %c32_38 = arith.constant 32 : index
    %55 = vector.load %arg15[%c0_37, %c32_38] : memref<4x320xf32, #tpu.memory_space<vmem>>, vector<4x256xf32>
    %c16_39 = arith.constant 16 : index
    %c0_40 = arith.constant 0 : index
    %56 = vector.load %arg16[%c16_39, %c0_40] : memref<36x256xf32, #tpu.memory_space<vmem>>, vector<4x256xf32>
    tpu.vector_store %arg16[%c16_39, %c0_40], %55 {strides = array<i32>} : memref<36x256xf32, #tpu.memory_space<vmem>>, vector<4x256xf32>,
    %c0_41 = arith.constant 0 : index
    %c33 = arith.constant 33 : index
    %57 = vector.load %arg15[%c0_41, %c33] : memref<4x320xf32, #tpu.memory_space<vmem>>, vector<4x256xf32>
    %58 = vector.broadcast %35 : vector<1x256xf32> to vector<4x256xf32>
    %59 = arith.mulf %57, %58 : vector<4x256xf32>
    %c20 = arith.constant 20 : index
    %c0_42 = arith.constant 0 : index
    %60 = vector.load %arg16[%c20, %c0_42] : memref<36x256xf32, #tpu.memory_space<vmem>>, vector<4x256xf32>
    tpu.vector_store %arg16[%c20, %c0_42], %59 {strides = array<i32>} : memref<36x256xf32, #tpu.memory_space<vmem>>, vector<4x256xf32>,
    %c0_43 = arith.constant 0 : index
    %c47 = arith.constant 47 : index
    %61 = vector.load %arg15[%c0_43, %c47] : memref<4x320xf32, #tpu.memory_space<vmem>>, vector<4x256xf32>
    %62 = vector.broadcast %34 : vector<1x256xf32> to vector<4x256xf32>
    %63 = arith.mulf %61, %62 : vector<4x256xf32>
    %c24 = arith.constant 24 : index
    %c0_44 = arith.constant 0 : index
    %64 = vector.load %arg16[%c24, %c0_44] : memref<36x256xf32, #tpu.memory_space<vmem>>, vector<4x256xf32>
    tpu.vector_store %arg16[%c24, %c0_44], %63 {strides = array<i32>} : memref<36x256xf32, #tpu.memory_space<vmem>>, vector<4x256xf32>,
    %c0_45 = arith.constant 0 : index
    %c48 = arith.constant 48 : index
    %65 = vector.load %arg15[%c0_45, %c48] : memref<4x320xf32, #tpu.memory_space<vmem>>, vector<4x256xf32>
    %c28 = arith.constant 28 : index
    %c0_46 = arith.constant 0 : index
    %66 = vector.load %arg16[%c28, %c0_46] : memref<36x256xf32, #tpu.memory_space<vmem>>, vector<4x256xf32>
    tpu.vector_store %arg16[%c28, %c0_46], %65 {strides = array<i32>} : memref<36x256xf32, #tpu.memory_space<vmem>>, vector<4x256xf32>,
    %c0_47 = arith.constant 0 : index
    %c49 = arith.constant 49 : index
    %67 = vector.load %arg15[%c0_47, %c49] : memref<4x320xf32, #tpu.memory_space<vmem>>, vector<4x256xf32>
    %68 = vector.broadcast %35 : vector<1x256xf32> to vector<4x256xf32>
    %69 = arith.mulf %67, %68 : vector<4x256xf32>
    %c32_48 = arith.constant 32 : index
    %c0_49 = arith.constant 0 : index
    %70 = vector.load %arg16[%c32_48, %c0_49] : memref<36x256xf32, #tpu.memory_space<vmem>>, vector<4x256xf32>
    tpu.vector_store %arg16[%c32_48, %c0_49], %69 {strides = array<i32>} : memref<36x256xf32, #tpu.memory_space<vmem>>, vector<4x256xf32>,
    %c0_50 = arith.constant 0 : index
    %c0_51 = arith.constant 0 : index
    %71 = vector.load %arg8[%c0_50, %c0_51] : memref<8x36xf32, #tpu.memory_space<vmem>>, vector<8x36xf32>
    %c0_52 = arith.constant 0 : index
    %c0_53 = arith.constant 0 : index
    %72 = vector.load %arg16[%c0_52, %c0_53] : memref<36x256xf32, #tpu.memory_space<vmem>>, vector<36x256xf32>
    %cst_54 = arith.constant dense<0.000000e+00> : vector<8x256xf32>
    %73 = tpu.matmul %71, %72, %cst_54 {dimension_numbers = #tpu.dot_dimension_numbers<[1], [0], [0], [1], [0, 0, 1, 1], [], []>} : vector<8x36xf32>, vector<36x256xf32>, vector<8x256xf32> -> vector<8x256xf32>
    %c0_55 = arith.constant 0 : index
    %c0_56 = arith.constant 0 : index
    %74 = vector.load %arg9[%c0_55, %c0_56] : memref<8x1xf32, #tpu.memory_space<vmem>>, vector<8x1xf32>
    %75 = vector.broadcast %74 : vector<8x1xf32> to vector<8x256xf32>
    %76 = arith.addf %73, %75 : vector<8x256xf32>
    %77 = vector.broadcast %33 : vector<8x1xf32> to vector<8x256xf32>
    %78 = arith.addf %76, %77 : vector<8x256xf32>
    %79 = arith.negf %78 : vector<8x256xf32>
    %80 = math.exp %79 : vector<8x256xf32>
    %cst_57 = arith.constant 1.000000e+00 : f32
    %81 = vector.broadcast %cst_57 : f32 to vector<8x256xf32>
    %82 = arith.addf %81, %80 : vector<8x256xf32>
    %83 = arith.divf %81, %82 : vector<8x256xf32>
    %84 = arith.mulf %78, %83 : vector<8x256xf32>
    %cst_58 = arith.constant 0.000000e+00 : f32
    %85 = vector.broadcast %cst_58 : f32 to vector<8x320xf32>
    %c0_59 = arith.constant 0 : index
    %c0_60 = arith.constant 0 : index
    %86 = vector.load %arg17[%c0_59, %c0_60] : memref<8x320xf32, #tpu.memory_space<vmem>>, vector<8x320xf32>
    tpu.vector_store %arg17[%c0_59, %c0_60], %85 {strides = array<i32>} : memref<8x320xf32, #tpu.memory_space<vmem>>, vector<8x320xf32>,
    %c0_61 = arith.constant 0 : index
    %c32_62 = arith.constant 32 : index
    %87 = vector.load %arg17[%c0_61, %c32_62] : memref<8x320xf32, #tpu.memory_space<vmem>>, vector<8x256xf32>
    tpu.vector_store %arg17[%c0_61, %c32_62], %84 {strides = array<i32>} : memref<8x320xf32, #tpu.memory_space<vmem>>, vector<8x256xf32>,
    %c0_63 = arith.constant 0 : index
    %c15_64 = arith.constant 15 : index
    %88 = vector.load %arg17[%c0_63, %c15_64] : memref<8x320xf32, #tpu.memory_space<vmem>>, vector<8x256xf32>
    %89 = vector.broadcast %34 : vector<1x256xf32> to vector<8x256xf32>
    %90 = arith.mulf %88, %89 : vector<8x256xf32>
    %c0_65 = arith.constant 0 : index
    %c0_66 = arith.constant 0 : index
    %91 = vector.load %arg18[%c0_65, %c0_66] : memref<72x256xf32, #tpu.memory_space<vmem>>, vector<8x256xf32>
    tpu.vector_store %arg18[%c0_65, %c0_66], %90 {strides = array<i32>} : memref<72x256xf32, #tpu.memory_space<vmem>>, vector<8x256xf32>,
    %c0_67 = arith.constant 0 : index
    %c16_68 = arith.constant 16 : index
    %92 = vector.load %arg17[%c0_67, %c16_68] : memref<8x320xf32, #tpu.memory_space<vmem>>, vector<8x256xf32>
    %c8_69 = arith.constant 8 : index
    %c0_70 = arith.constant 0 : index
    %93 = vector.load %arg18[%c8_69, %c0_70] : memref<72x256xf32, #tpu.memory_space<vmem>>, vector<8x256xf32>
    tpu.vector_store %arg18[%c8_69, %c0_70], %92 {strides = array<i32>} : memref<72x256xf32, #tpu.memory_space<vmem>>, vector<8x256xf32>,
    %c0_71 = arith.constant 0 : index
    %c17_72 = arith.constant 17 : index
    %94 = vector.load %arg17[%c0_71, %c17_72] : memref<8x320xf32, #tpu.memory_space<vmem>>, vector<8x256xf32>
    %95 = vector.broadcast %35 : vector<1x256xf32> to vector<8x256xf32>
    %96 = arith.mulf %94, %95 : vector<8x256xf32>
    %c16_73 = arith.constant 16 : index
    %c0_74 = arith.constant 0 : index
    %97 = vector.load %arg18[%c16_73, %c0_74] : memref<72x256xf32, #tpu.memory_space<vmem>>, vector<8x256xf32>
    tpu.vector_store %arg18[%c16_73, %c0_74], %96 {strides = array<i32>} : memref<72x256xf32, #tpu.memory_space<vmem>>, vector<8x256xf32>,
    %c0_75 = arith.constant 0 : index
    %c31_76 = arith.constant 31 : index
    %98 = vector.load %arg17[%c0_75, %c31_76] : memref<8x320xf32, #tpu.memory_space<vmem>>, vector<8x256xf32>
    %99 = vector.broadcast %34 : vector<1x256xf32> to vector<8x256xf32>
    %100 = arith.mulf %98, %99 : vector<8x256xf32>
    %c24_77 = arith.constant 24 : index
    %c0_78 = arith.constant 0 : index
    %101 = vector.load %arg18[%c24_77, %c0_78] : memref<72x256xf32, #tpu.memory_space<vmem>>, vector<8x256xf32>
    tpu.vector_store %arg18[%c24_77, %c0_78], %100 {strides = array<i32>} : memref<72x256xf32, #tpu.memory_space<vmem>>, vector<8x256xf32>,
    %c0_79 = arith.constant 0 : index
    %c32_80 = arith.constant 32 : index
    %102 = vector.load %arg17[%c0_79, %c32_80] : memref<8x320xf32, #tpu.memory_space<vmem>>, vector<8x256xf32>
    %c32_81 = arith.constant 32 : index
    %c0_82 = arith.constant 0 : index
    %103 = vector.load %arg18[%c32_81, %c0_82] : memref<72x256xf32, #tpu.memory_space<vmem>>, vector<8x256xf32>
    tpu.vector_store %arg18[%c32_81, %c0_82], %102 {strides = array<i32>} : memref<72x256xf32, #tpu.memory_space<vmem>>, vector<8x256xf32>,
    %c0_83 = arith.constant 0 : index
    %c33_84 = arith.constant 33 : index
    %104 = vector.load %arg17[%c0_83, %c33_84] : memref<8x320xf32, #tpu.memory_space<vmem>>, vector<8x256xf32>
    %105 = vector.broadcast %35 : vector<1x256xf32> to vector<8x256xf32>
    %106 = arith.mulf %104, %105 : vector<8x256xf32>
    %c40 = arith.constant 40 : index
    %c0_85 = arith.constant 0 : index
    %107 = vector.load %arg18[%c40, %c0_85] : memref<72x256xf32, #tpu.memory_space<vmem>>, vector<8x256xf32>
    tpu.vector_store %arg18[%c40, %c0_85], %106 {strides = array<i32>} : memref<72x256xf32, #tpu.memory_space<vmem>>, vector<8x256xf32>,
    %c0_86 = arith.constant 0 : index
    %c47_87 = arith.constant 47 : index
    %108 = vector.load %arg17[%c0_86, %c47_87] : memref<8x320xf32, #tpu.memory_space<vmem>>, vector<8x256xf32>
    %109 = vector.broadcast %34 : vector<1x256xf32> to vector<8x256xf32>
    %110 = arith.mulf %108, %109 : vector<8x256xf32>
    %c48_88 = arith.constant 48 : index
    %c0_89 = arith.constant 0 : index
    %111 = vector.load %arg18[%c48_88, %c0_89] : memref<72x256xf32, #tpu.memory_space<vmem>>, vector<8x256xf32>
    tpu.vector_store %arg18[%c48_88, %c0_89], %110 {strides = array<i32>} : memref<72x256xf32, #tpu.memory_space<vmem>>, vector<8x256xf32>,
    %c0_90 = arith.constant 0 : index
    %c48_91 = arith.constant 48 : index
    %112 = vector.load %arg17[%c0_90, %c48_91] : memref<8x320xf32, #tpu.memory_space<vmem>>, vector<8x256xf32>
    %c56 = arith.constant 56 : index
    %c0_92 = arith.constant 0 : index
    %113 = vector.load %arg18[%c56, %c0_92] : memref<72x256xf32, #tpu.memory_space<vmem>>, vector<8x256xf32>
    tpu.vector_store %arg18[%c56, %c0_92], %112 {strides = array<i32>} : memref<72x256xf32, #tpu.memory_space<vmem>>, vector<8x256xf32>,
    %c0_93 = arith.constant 0 : index
    %c49_94 = arith.constant 49 : index
    %114 = vector.load %arg17[%c0_93, %c49_94] : memref<8x320xf32, #tpu.memory_space<vmem>>, vector<8x256xf32>
    %115 = vector.broadcast %35 : vector<1x256xf32> to vector<8x256xf32>
    %116 = arith.mulf %114, %115 : vector<8x256xf32>
    %c64 = arith.constant 64 : index
    %c0_95 = arith.constant 0 : index
    %117 = vector.load %arg18[%c64, %c0_95] : memref<72x256xf32, #tpu.memory_space<vmem>>, vector<8x256xf32>
    tpu.vector_store %arg18[%c64, %c0_95], %116 {strides = array<i32>} : memref<72x256xf32, #tpu.memory_space<vmem>>, vector<8x256xf32>,
    %c0_96 = arith.constant 0 : index
    %c0_97 = arith.constant 0 : index
    %118 = vector.load %arg10[%c0_96, %c0_97] : memref<4x72xf32, #tpu.memory_space<vmem>>, vector<4x72xf32>
    %c0_98 = arith.constant 0 : index
    %c0_99 = arith.constant 0 : index
    %119 = vector.load %arg18[%c0_98, %c0_99] : memref<72x256xf32, #tpu.memory_space<vmem>>, vector<72x256xf32>
    %cst_100 = arith.constant dense<0.000000e+00> : vector<4x256xf32>
    %120 = tpu.matmul %118, %119, %cst_100 {dimension_numbers = #tpu.dot_dimension_numbers<[1], [0], [0], [1], [0, 0, 1, 1], [], []>} : vector<4x72xf32>, vector<72x256xf32>, vector<4x256xf32> -> vector<4x256xf32>
    %c0_101 = arith.constant 0 : index
    %c0_102 = arith.constant 0 : index
    %121 = vector.load %arg11[%c0_101, %c0_102] : memref<4x1xf32, #tpu.memory_space<vmem>>, vector<4x1xf32>
    %122 = vector.broadcast %121 : vector<4x1xf32> to vector<4x256xf32>
    %123 = arith.addf %120, %122 : vector<4x256xf32>
    %c0_103 = arith.constant 0 : index
    %c0_104 = arith.constant 0 : index
    %c0_105 = arith.constant 0 : index
    %124 = vector.load %arg14[%c0_103, %c0_104, %c0_105] : memref<1x4x256xf32, #tpu.memory_space<vmem>>, vector<1x4x256xf32>
    %125 = vector.shape_cast %124 : vector<1x4x256xf32> to vector<4x256xf32>
    %126 = vector.shape_cast %123 : vector<4x256xf32> to vector<1x4x256xf32>
    tpu.vector_store %arg14[%c0_103, %c0_104, %c0_105], %126 {strides = array<i32>} : memref<1x4x256xf32, #tpu.memory_space<vmem>>, vector<1x4x256xf32>,
    return
  }
  func.func @transform_0(%arg0: i32) -> (i32, i32) {
    %c0_i32 = arith.constant 0 : i32
    %c0_i32_0 = arith.constant 0 : i32
    %c0_i32_1 = arith.constant 0 : i32
    return %c0_i32, %c0_i32_0 : i32, i32
  }
  func.func @transform_1(%arg0: i32) -> (i32, i32) {
    %c0_i32 = arith.constant 0 : i32
    %c0_i32_0 = arith.constant 0 : i32
    %c0_i32_1 = arith.constant 0 : i32
    return %c0_i32, %c0_i32_0 : i32, i32
  }
  func.func @transform_2(%arg0: i32) -> (i32, i32) {
    %c0_i32 = arith.constant 0 : i32
    %c0_i32_0 = arith.constant 0 : i32
    %c0_i32_1 = arith.constant 0 : i32
    return %c0_i32, %c0_i32_0 : i32, i32
  }
  func.func @transform_3(%arg0: i32) -> (i32, i32) {
    %c0_i32 = arith.constant 0 : i32
    %c0_i32_0 = arith.constant 0 : i32
    %c0_i32_1 = arith.constant 0 : i32
    return %c0_i32, %c0_i32_0 : i32, i32
  }
  func.func @transform_4(%arg0: i32) -> (i32, i32) {
    %c0_i32 = arith.constant 0 : i32
    %c0_i32_0 = arith.constant 0 : i32
    %c0_i32_1 = arith.constant 0 : i32
    return %c0_i32, %c0_i32_0 : i32, i32
  }
  func.func @transform_5(%arg0: i32) -> (i32, i32) {
    %c0_i32 = arith.constant 0 : i32
    %c0_i32_0 = arith.constant 0 : i32
    %c0_i32_1 = arith.constant 0 : i32
    return %c0_i32, %c0_i32_0 : i32, i32
  }
  func.func @transform_6(%arg0: i32) -> (i32, i32) {
    %c0_i32 = arith.constant 0 : i32
    %c0_i32_0 = arith.constant 0 : i32
    %c0_i32_1 = arith.constant 0 : i32
    return %c0_i32, %c0_i32_0 : i32, i32
  }
  func.func @transform_7(%arg0: i32) -> (i32, i32) {
    %c0_i32 = arith.constant 0 : i32
    %c0_i32_0 = arith.constant 0 : i32
    %c0_i32_1 = arith.constant 0 : i32
    return %c0_i32, %c0_i32_0 : i32, i32
  }
  func.func @transform_8(%arg0: i32) -> (i32, i32) {
    %c0_i32 = arith.constant 0 : i32
    %c0_i32_0 = arith.constant 0 : i32
    %c0_i32_1 = arith.constant 0 : i32
    return %c0_i32, %c0_i32_0 : i32, i32
  }
  func.func @transform_9(%arg0: i32) -> (i32, i32) {
    %c0_i32 = arith.constant 0 : i32
    %c0_i32_0 = arith.constant 0 : i32
    %c0_i32_1 = arith.constant 0 : i32
    return %c0_i32, %c0_i32_0 : i32, i32
  }
  func.func @transform_10(%arg0: i32) -> (i32, i32) {
    %c0_i32 = arith.constant 0 : i32
    %c0_i32_0 = arith.constant 0 : i32
    %c0_i32_1 = arith.constant 0 : i32
    return %c0_i32, %c0_i32_0 : i32, i32
  }
  func.func @transform_11(%arg0: i32) -> (i32, i32) {
    %c0_i32 = arith.constant 0 : i32
    %c0_i32_0 = arith.constant 0 : i32
    %c0_i32_1 = arith.constant 0 : i32
    return %c0_i32, %c0_i32_0 : i32, i32
  }
  func.func @transform_12(%arg0: i32) -> (i32, i32, i32) {
    %c0_i32 = arith.constant 0 : i32
    %c0_i32_0 = arith.constant 0 : i32
    %c0_i32_1 = arith.constant 0 : i32
    return %arg0, %c0_i32, %c0_i32_0 : i32, i32, i32
  }
  func.func @transform_13(%arg0: i32) -> (i32, i32, i32) {
    %c0_i32 = arith.constant 0 : i32
    %c0_i32_0 = arith.constant 0 : i32
    %c0_i32_1 = arith.constant 0 : i32
    return %arg0, %c0_i32, %c0_i32_0 : i32, i32, i32
  }
}

</mosaic_0001>

<bundles_post_ra>
// kernel: fused_forward.1
= control target key start
LH: loop header
LB: loop body
LE: loop exit
PB: predicated region body
PF: predicated region fallthrough
CT: control target
= control target key end

     0   :  { %s1952_s25 = smov 0   ;;  %s2241_s0 = inlined_call_operand.vmem [shape: f32[32,2], index: 0, kind: input, shape index: {}]   ;;  %s2242_s1 = inlined_call_operand.vmem [shape: f32[32,32], index: 1, kind: input, shape index: {}]   ;;  %s2243_s2 = inlined_call_operand.vmem [shape: f32[32,1], index: 2, kind: input, shape index: {}]   ;;  %s2244_s3 = inlined_call_operand.vmem [shape: f32[32,32], index: 3, kind: input, shape index: {}]   ;;  %s2245_s4 = inlined_call_operand.vmem [shape: f32[32,1], index: 4, kind: input, shape index: {}]   ;;  %s2246_s5 = inlined_call_operand.vmem [shape: f32[8,32], index: 5, kind: input, shape index: {}]   ;;  %s2247_s6 = inlined_call_operand.vmem [shape: f32[8,1], index: 6, kind: input, shape index: {}]   ;;  %s2248_s7 = inlined_call_operand.vmem [shape: f32[8,36], index: 7, kind: input, shape index: {}]   ;;  %s2249_s8 = inlined_call_operand.vmem [shape: f32[8,1], index: 8, kind: input, shape index: {}]   ;;  %s2250_s9 = inlined_call_operand.vmem [shape: f32[4,72], index: 9, kind: input, shape index: {}]   ;;  %s2251_s10 = inlined_call_operand.vmem [shape: f32[4,1], index: 10, kind: input, shape index: {}]   ;;  %s2252_s11 = inlined_call_operand.vmem [shape: f32[2,256], index: 11, kind: input, shape index: {}]   ;;  %s2253_s12 = inlined_call_operand.vmem [shape: f32[2,4,256], index: 12, kind: input, shape index: {}]   ;;  %s2254_s13 = inlined_call_operand.vmem [shape: f32[2,4,256], index: 13, kind: output, shape index: {}]  }
   0x1 LB: > { %s1958_s26 = sadd.s32 4294967295, %s1860_s25   ;;  %p1600_p0 = scmp.ge.s32.totalorder %s1860_s25, 1  ;;  %s1860_s25 = sphi %s1952_s25, %s23_s25  }
   0x2   : > { %p387_p1 = scmp.lt.s32.totalorder %s1860_s25, 3 }
   0x4   : > { %p388_p2 = pnand %p1600_p0, %p387_p1 }
   0x5   : > { %v441_v0 = vlaneseq (!%p388_p2)  ;;  %v443_v1 = vstv (!%p388_p2), %s1958_s26  ;;  %v1862_v2 = vmov (!%p388_p2), 0.0   ;;  %v449_v4 = vld [vmem:[%s2241_s0 + $0x10] sm:$0xff] (!%p388_p2)  ;;  %v447_v5 = vld [vmem:[%s2241_s0] sm:$0xff] (!%p388_p2)  ;;  %v450_v6 = vld [vmem:[%s2241_s0 + $0x18] sm:$0xff] (!%p388_p2)  ;;  %vm455_vm1 = vcmask (!%p388_p2), 15360   ;;  %p431_p3 = scmp.lt.s32.totalorder (!%p388_p2), %s1958_s26, 1 }
   0x6   : > { %391 = sbr.rel (%p388_p2) target bundleno = 1542 (0x606), region = 72  ;;  %814 = vst [vmem:[#allocation2] sm:$0xff] (!%p388_p2), %v1862_v2  ;;  %1190 = vst [vmem:[#allocation4] sm:$0xff] (!%p388_p2), %v1862_v2  ;;  %v448_v7 = vld [vmem:[%s2241_s0 + $0x8] sm:$0xff] (!%p388_p2)  ;;  %v468_v17 = vld [vmem:[%s2242_s1] sm:$0xff] (!%p388_p2)  ;;  %vm476_vm2 = vcmask (!%p388_p2), 261120  }
   0x7   : > { %v442_v3 = vand.u32 (!%p388_p2), 127, %v441_v0  ;;  %1663 = vmatprep.mubr.msk.f32.mxu1 (!%p388_p2), %vm476_vm2, %v468_v17  ;;  %v469_v24 = vld [vmem:[%s2242_s1 + $0x8] sm:$0xff] (!%p388_p2)  ;;  %v470_v25 = vld [vmem:[%s2242_s1 + $0x10] sm:$0xff] (!%p388_p2)  ;;  %v471_v26 = vld [vmem:[%s2242_s1 + $0x18] sm:$0xff] (!%p388_p2)  ;;  %v834_v28 = vshrl.u32 (!%p388_p2), %v441_v0, 7  ;;  %vm815_vm3 = vcmask (!%p388_p2), 519168  }
   0x8   : > { %v602_v27 = vld [vmem:[%s2244_s3] sm:$0xff] (!%p388_p2)  ;;  %816 = vst.msk [vmem:[#allocation2 + $0x8] sm:$0xf] (!%p388_p2), %vm815_vm3, %v1862_v2  ;;  %s1863_s21 = smov (!%p388_p2), 32   ;;  %s1864_s22 = smov (!%p388_p2), 15   ;;  %v473_v40 = vld [vmem:[%s2243_s2 + $0x8] sm:$0xff] (!%p388_p2) }
   0x9   : > { %vm444_vm0 = vcmp.eq.s32.totalorder (!%p388_p2), %v442_v3, %v443_v1  ;;  %v810_v29 = vld [vmem:[%s2252_s11] ss:$2 sm:$0x3] (!%p388_p2)  ;;  %v835_v30 = vsub.s32 (!%p388_p2), 0, %v834_v28  ;;  %v839_v31 = vsub.s32 (!%p388_p2), 1, %v834_v28  ;;  %s1865_s23 = smov (!%p388_p2), 17  }
   0xa   : > { %v1605_v8 = vsel (!%p388_p2), %vm444_vm0, 1.0, %v1862_v2  ;;  %v1623_v32 = vld [vmem:[%s2252_s11 + $0x1] ss:$2 sm:$0x3] (!%p388_p2)  ;;  %s1866_s24 = smov (!%p388_p2), 47   ;;  %s1867_s27 = smov (!%p388_p2), 31  }
   0xb   : > { %v453_v9 = vmul.f32 (!%p388_p2), %v1605_v8, %v449_v4  ;;  %v451_v10 = vmul.f32 (!%p388_p2), %v1605_v8, %v447_v5  ;;  %v454_v11 = vmul.f32 (!%p388_p2), %v1605_v8, %v450_v6  ;;  %v452_v12 = vmul.f32 (!%p388_p2), %v1605_v8, %v448_v7  ;;  %s1868_s28 = smov (!%p388_p2), 49   ;;  %s1869_s29 = smov (!%p388_p2), 33   ;;  %v472_v41 = vld [vmem:[%s2243_s2] sm:$0xff] (!%p388_p2)  ;;  %v475_v46 = vld [vmem:[%s2243_s2 + $0x18] sm:$0xff] (!%p388_p2)  ;;  %v474_v48 = vld [vmem:[%s2243_s2 + $0x10] sm:$0xff] (!%p388_p2) }
   0xc   : > { %v2008_v33 = vrot.slane (!%p388_p2), %v810_v29, %v835_v30  ;;  %v2010_v34 = vrot.slane (!%p388_p2), %v810_v29, %v839_v31  ;;  %v2012_v35 = vrot.slane (!%p388_p2), %v1623_v32, %v835_v30  ;;  %v2014_v36 = vrot.slane (!%p388_p2), %v1623_v32, %v839_v31  ;;  %v605_v17 = vld [vmem:[%s2244_s3 + $0x18] sm:$0xff] (!%p388_p2)  ;;  %s2274_s19 = smov (!%p388_p2), 96   ;;  %s2264_s30 = smov (!%p388_p2), 80  }
   0xd   : > { %v462_v13 = vsel %vm455_vm1, %v453_v9, 0.0  ;;  %v456_v14 = vsel %vm455_vm1, %v451_v10, 0.0  ;;  %v465_v15 = vsel %vm455_vm1, %v454_v11, 0.0  ;;  %v459_v16 = vsel %vm455_vm1, %v452_v12, 0.0  ;;  %s2291_s26 = smov (!%p431_p3, %s1958_s26), 1  ;;  %v603_v11 = vld [vmem:[%s2244_s3 + $0x8] sm:$0xff] }
   0xe   : > { %463 = vadd.xlane.f32.xlu1 %v462_v13  ;;  %457 = vadd.xlane.f32.xlu0 %v456_v14  ;;  %s2255_s17 = sshll.u32 %s2291_s26, 3  ;;  %v841_v37 = vcombine.low %v2008_v33, %v2010_v34  ;;  %v897_v39 = vcombine.low %v2012_v35, %v2014_v36  ;;  %vm824_vm4 = vcmask 1043712   ;;  %vm825_vm5 = vcmask 1047556   ;;  %v604_v14 = vld [vmem:[%s2244_s3 + $0x10] sm:$0xff]  ;;  %s2268_s14 = smov 111  }
   0xf   : > { %s435_s20 = scalar_lea.vmem %s2253_s12, %s2255_s17  ;;  %vm828_vm6 = vcmask 257024   ;;  %vm826_vm7 = vmor %vm825_vm5, %vm824_vm4  ;;  %vm928_vm8 = vcmask 252928   ;;  %s2270_s17 = smov 113   ;;  %vm845_vm9 = vcmask 121856   ;;  %vm901_vm10 = vcmask 138240  }
  0x10   : > { %v813_v38 = vld [vmem:[%s435_s20] sm:$0xff]  ;;  %s2272_s20 = smov 112   ;;  %s2256_s15 = smov 97   ;;  %vm974_vm11 = vcmask 269312   ;;  %vm1002_vm12 = vcmask 384000   ;;  %vm1048_vm13 = vcmask 400384  }
  0x11   : > { %s2261_s16 = smov 81   ;;  %s2266_s18 = smov 95   ;;  %vm1880_vm14 = vmmov 0   ;;  %vm879_vm15 = vcmask 916480   ;;  %vm2263_vm0 = vcmask 654336   ;;  %vm962_vm1 = vcmask 785408  }
  0x12   : > { %466 = vadd.xlane.f32.xlu1 %v465_v15  ;;  %460 = vadd.xlane.f32.xlu0 %v459_v16  ;;  %vm944_vm3 = vcmask 793600   ;;  %vm990_vm4 = vcmask 777216   ;;  %vm860_vm5 = vcmask 924672  }
  0x13   : > { %1691 = vmatprep.mubr.msk.f32.mxu0 %vm1880_vm14, %v1862_v2  ;;  %vm1063_vm14 = vcmask 646144  }
  0x23   : > { %842 = vrot.lane.b32.xlu1 %v841_v37, %s1864_s22 }
  0x27   : > { %898 = vrot.lane.b32.xlu1 %v897_v39, %s1865_s23 }
  0x28   : > { %818 = vrot.lane.b32.xlu0 %v813_v38, %s1863_s21 }
  0x2b   : > { %925 = vrot.lane.b32.xlu1 %v841_v37, %s1867_s27 }
  0x2c   : > { %999 = vrot.lane.b32.xlu0 %v841_v37, %s1866_s24 }
  0x2f   : > { %971 = vrot.lane.b32.xlu1 %v897_v39, %s1869_s29 }
  0x30   : > { %1045 = vrot.lane.b32.xlu0 %v897_v39, %s1868_s28 }
  0x9b   : > { %v464_v18 = vpop.xlane.xlu1 %463  ;;  %v458_v19 = vpop.xlane.xlu0 %457 }
  0x9f   : > { %v467_v20 = vpop.xlane.xlu1 %466  ;;  %v461_v21 = vpop.xlane.xlu0 %460 }
  0xa0   : > { %v1694_v22 = vpack.c.bf16 %v461_v21, %v458_v19  ;;  %v1698_v23 = vpack.c.bf16 %v467_v20, %v464_v18 }
  0xa2   : > { %1695 = vmatprep.subr.bf16.mxu1 %v1694_v22 }
  0xa3   : > { %1697 = vmatpush3.bf16.msra.mxu1 %v1694_v22  ;;  %v819_v12 = vpop.permute.xlu0 %818  ;;  %v843_v13 = vpop.permute.xlu1 %842 }
  0xa4   : > { %1699 = vmatprep.subr.bf16.mxu1 %v1698_v23  ;;  %v820_v15 = vrot.slane %v819_v12, 4  ;;  %v844_v19 = vrot.slane %v843_v13, 4 }
  0xa6   : > { %v821_v16 = vsel %vm476_vm2, %v820_v15, %v819_v12  ;;  %829 = vst.msk [vmem:[#allocation2 + $0x8] sm:$0xf] %vm828_vm6, %v820_v15  ;;  %v846_v39 = vsel %vm845_vm9, %v844_v19, %v843_v13  ;;  %vm916_vm6 = vcmask 908288  }
  0xa7   : > { %1701 = vmatpush3.bf16.msra.mxu1 %v1698_v23  ;;  %827 = vst.msk [vmem:[#allocation2] sm:$0xff] %vm826_vm7, %v821_v16  ;;  %v899_v18 = vpop.permute.xlu1 %898  ;;  %v1000_v29 = vpop.permute.xlu0 %999  ;;  %vm2258_vm7 = vcmask 662528  }
  0xa8   : > { %v1001_v32 = vrot.slane %v1000_v29, 4 }
  0xaa   : > { %1664 = vmatmul.mubr.msk.f32.vlgmr.msra.gmra.mrb[0].mxu1 %vm476_vm2, %v469_v24 }
  0xab   : > { %1666 = vmatprep.mubr.msk.f32.mxu1 %vm476_vm2, %v470_v25  ;;  %v926_v22 = vpop.permute.xlu1 %925 }
  0xac   : > { %v927_v25 = vrot.slane %v926_v22, 4 }
  0xad   : > { %v831_v20 = vld [vmem:[#allocation2 + $0x8] sm:$0xf] }
  0xae   : > { %1667 = vmatmul.mubr.msk.f32.gmra.mrb[2].mxu1 %vm476_vm2, %v471_v26  ;;  %v952_v21 = vld [vmem:[#allocation2 + $0x8] sm:$0xf]  ;;  %v2060_v23 = vld [vmem:[#allocation2] sm:$0xff]  ;;  %v850_v24 = vmul.f32 %v844_v19, %v831_v20  ;;  %v900_v26 = vrot.slane %v899_v18, 4  ;;  %v929_v30 = vsel %vm928_vm8, %v927_v25, %v926_v22 }
  0xaf   : > { %1677 = vmatprep.mubr.msk.f32.mxu1 %vm476_vm2, %v602_v27  ;;  %960 = vrot.lane.b32.xlu0 %v952_v21, %s2274_s19  ;;  %v1812_v27 = vld [vmem:[#allocation2 + $0x8] ss:$0 sps:$4 sm:$0xff]   ;;  %v932_v37 = vmul.f32 %v929_v30, %v2060_v23 }
  0xb0   : > { %875 = vrot.lane.b32.xlu1 %v2060_v23, %s2272_s20  ;;  %v887_v28 = vld [vmem:[#allocation2 + $0x8] sm:$0xf] }
  0xb1   : > { %v906_v31 = vmul.f32 %v900_v26, %v887_v28  ;;  %v998_v38 = vld [vmem:[#allocation2 + $0x8] sm:$0xf] }
  0xb3   : > { %858 = vrot.lane.b32.xlu0 %v850_v24, %s2270_s17 }
  0xb4   : > { %1032 = vrot.lane.b32.xlu1 %v2060_v23, %s2264_s30 }
  0xb7   : > { %877 = vrot.lane.b32.xlu0 %v1812_v27, %s2272_s20 }
  0xb8   : > { %956 = vrot.lane.b32.xlu1 %v2060_v23, %s2274_s19 }
  0xbb   : > { %914 = vrot.lane.b32.xlu0 %v906_v31, %s2268_s14 }
  0xbc   : > { %940 = vrot.lane.b32.xlu1 %v932_v37, %s2256_s15 }
 0x17d   : > { %v1665_v42 = vpop.f32.mrb[0].mxu1 }
 0x17e   : > { %v561_v43 = vadd.f32 %v1665_v42, %v473_v40  ;;  %v555_v44 = vpop.f32.mrb[1].mxu1  ;;  %v1007_v40 = vmul.f32 %v1001_v32, %v998_v38  ;;  %v902_v42 = vsel %vm901_vm10, %v900_v26, %v899_v18 }
 0x17f   : > { %v556_v45 = vadd.f32 %v555_v44, %v472_v41  ;;  %v849_v41 = vmul.f32 %v846_v39, %v2060_v23  ;;  %v1813_v44 = vld [vmem:[#allocation2 + $0x8] ss:$0 sps:$4 sm:$0xff]  }
 0x180   : > { %v1611_v47 = vmul.f32 -1.442695, %v561_v43  ;;  %1015 = vrot.lane.b32.xlu0 %v1007_v40, %s2261_s16 }
 0x181   : > { %v1610_v49 = vmul.f32 -1.442695, %v556_v45  ;;  %v1668_v50 = vpop.f32.mrb[2].mxu1  ;;  %854 = vrot.lane.b32.xlu1 %v849_v41, %s2270_s17 }
 0x182   : > { %1814 = vpow2.f32 %v1611_v47  ;;  %v571_v51 = vadd.f32 %v1668_v50, %v475_v46  ;;  %v565_v52 = vpop.f32.mrb[3].mxu1  ;;  %v924_v46 = vld [vmem:[#allocation2 + $0x8] sm:$0xf]  ;;  %v955_v50 = vcombine.high %v2060_v23, %v2060_v23 }
 0x183   : > { %1816 = vpow2.f32 %v1610_v49  ;;  %v566_v53 = vadd.f32 %v565_v52, %v474_v48  ;;  %v871_v48 = vcombine.low %v2060_v23, %v2060_v23  ;;  %v933_v49 = vmul.f32 %v927_v25, %v924_v46 }
 0x184   : > { %v1613_v54 = vmul.f32 -1.442695, %v571_v51  ;;  %1034 = vrot.lane.b32.xlu0 %v1813_v44, %s2264_s30 }
 0x185   : > { %v1612_v55 = vmul.f32 -1.442695, %v566_v53 }
 0x186   : > { %1818 = vpow2.f32 %v1613_v54  ;;  %v937_v54 = vcombine.low %v933_v49, %v933_v49 }
 0x187   : > { %1820 = vpow2.f32 %v1612_v55 }
 0x188   : > { %873 = vrot.lane.b32.xlu0 %v871_v48, %s2272_s20 }
 0x18c   : > { %v1815_v56 = vpop.eup %1814  ;;  %942 = vrot.lane.b32.xlu0 %v937_v54, %s2256_s15 }
 0x18d   : > { %v1817_v57 = vpop.eup %1816  ;;  %v587_v58 = vadd.f32 1.0, %v1815_v56  ;;  %v1003_v56 = vsel %vm1002_vm12, %v1001_v32, %v1000_v29 }
 0x18e   : > { %v586_v59 = vadd.f32 1.0, %v1817_v57 }
 0x18f   : > { %1822 = vrcp.f32 %v587_v58  ;;  %v1006_v58 = vmul.f32 %v1003_v56, %v2060_v23 }
 0x190   : > { %v1819_v60 = vpop.eup %1818  ;;  %1824 = vrcp.f32 %v586_v59  ;;  %v1046_v59 = vpop.permute.xlu0 %1045 }
 0x191   : > { %v1821_v61 = vpop.eup %1820  ;;  %v589_v62 = vadd.f32 1.0, %v1819_v60  ;;  %v936_v60 = vcombine.low %v932_v37, %v932_v37 }
 0x192   : > { %v588_v63 = vadd.f32 1.0, %v1821_v61  ;;  %v853_v61 = vcombine.high %v849_v41, %v849_v41 }
 0x193   : > { %1826 = vrcp.f32 %v589_v62  ;;  %v1047_v62 = vrot.slane %v1046_v59, 4 }
 0x194   : > { %1828 = vrcp.f32 %v588_v63 }
 0x199   : > { %v1823_v0 = vpop.eup %1822 }
 0x19a   : > { %v1825_v1 = vpop.eup %1824  ;;  %v599_v3 = vmul.f32 %v1823_v0, %v561_v43  ;;  %v972_v43 = vpop.permute.xlu1 %971 }
 0x19b   : > { %v598_v4 = vmul.f32 %v1825_v1, %v556_v45  ;;  %v905_v45 = vmul.f32 %v902_v42, %v2060_v23  ;;  %v973_v47 = vrot.slane %v972_v43, 4  ;;  %v1049_v1 = vsel %vm1048_vm13, %v1047_v62, %v1046_v59 }
 0x19d   : > { %v1827_v5 = vpop.eup %1826  ;;  %v1702_v6 = vpack.c.bf16 %v599_v3, %v598_v4  ;;  %910 = vrot.lane.b32.xlu1 %v905_v45, %s2268_s14  ;;  %v975_v52 = vsel %vm974_vm11, %v973_v47, %v972_v43  ;;  %v909_v0 = vcombine.high %v905_v45, %v905_v45  ;;  %v1044_v3 = vld [vmem:[#allocation2 + $0x8] sm:$0xf]  ;;  %v1052_v4 = vmul.f32 %v1049_v1, %v2060_v23 }
 0x19e   : > { %v1829_v7 = vpop.eup %1828  ;;  %v601_v8 = vmul.f32 %v1827_v5, %v571_v51  ;;  %v970_v51 = vld [vmem:[#allocation2 + $0x8] sm:$0xf]  ;;  %v978_v55 = vmul.f32 %v975_v52, %v2060_v23  ;;  %v1010_v5 = vcombine.high %v1006_v58, %v1006_v58 }
 0x19f   : > { %v600_v9 = vmul.f32 %v1829_v7, %v566_v53  ;;  %1703 = vmatprep.subr.bf16.mxu1 %v1702_v6  ;;  %v979_v53 = vmul.f32 %v973_v47, %v970_v51  ;;  %v1056_v7 = vcombine.high %v1052_v4, %v1052_v4 }
 0x1a0   : > { %1705 = vmatpush3.bf16.msra.mxu1 %v1702_v6  ;;  %v982_v63 = vcombine.low %v978_v55, %v978_v55  ;;  %v1053_v6 = vmul.f32 %v1047_v62, %v1044_v3 }
 0x1a1   : > { %v1706_v10 = vpack.c.bf16 %v601_v8, %v600_v9  ;;  %958 = vrot.lane.b32.xlu1 %v955_v50, %s2274_s19  ;;  %v983_v57 = vcombine.low %v979_v53, %v979_v53  ;;  %v1879_v8 = vmov 0.0|0.0   ;;  %v876_v9 = vpop.permute.xlu1 %875 }
 0x1a2   : > { %1710 = vmatprep.subr.bf16.mxu0 %v1879_v8 }
 0x1a3   : > { %1707 = vmatprep.subr.bf16.mxu1 %v1706_v10  ;;  %988 = vrot.lane.b32.xlu0 %v983_v57, %s2266_s18 }
 0x1a4   : > { %1709 = vmatpush3.bf16.msra.mxu1 %v1706_v10  ;;  %v961_v10 = vpop.permute.xlu0 %960 }
 0x1a5   : > { %986 = vrot.lane.b32.xlu1 %v978_v55, %s2266_s18  ;;  %v1033_v12 = vpop.permute.xlu1 %1032 }
 0x1a7   : > { %1678 = vmatmul.mubr.msk.f32.vlgmr.msra.gmra.mrb[4].mxu1 %vm476_vm2, %v603_v11  ;;  %938 = vrot.lane.b32.xlu0 %v936_v60, %s2256_s15  ;;  %s2259_s15 = smov 79   ;;  %v1881_v11 = vmov 0  }
 0x1a8   : > { %1680 = vmatprep.mubr.msk.f32.mxu1 %vm476_vm2, %v604_v14  ;;  %1768 = vset.pattern.permute.xlu0 %v1881_v11  ;;  %v859_v13 = vpop.permute.xlu0 %858 }
 0x1a9   : > { %1011 = vrot.lane.b32.xlu1 %v1006_v58, %s2261_s16  ;;  %v957_v14 = vpop.permute.xlu1 %956 }
 0x1aa   : > { %1769 = vset.pattern.permute.xlu1 %v1881_v11 }
 0x1ab   : > { %1681 = vmatmul.mubr.msk.f32.gmra.mrb[6].mxu1 %vm476_vm2, %v605_v17  ;;  %984 = vrot.lane.b32.xlu0 %v982_v63, %s2266_s18 }
 0x1ac   : > { %1162 = vmatprep.mubr.f32.mxu1 %v1862_v2  ;;  %v878_v15 = vpop.permute.xlu0 %877 }
 0x1ad   : > { %856 = vrot.lane.b32.xlu1 %v853_v61, %s2270_s17  ;;  %v881_v16 = vsel %vm879_vm15, %v876_v9, %v878_v15  ;;  %v941_v17 = vpop.permute.xlu1 %940 }
 0x1ae   : > { %885 = vst [vmem:[#allocation3 + $0x8] sm:$0xf0] %v881_v16 }
 0x1af   : > { %1030 = vrot.lane.b32.xlu0 %v871_v48, %s2264_s30 }
 0x1b0   : > { %v915_v18 = vpop.permute.xlu0 %914 }
 0x1b1   : > { %912 = vrot.lane.b32.xlu1 %v909_v0, %s2268_s14  ;;  %s2289_s14 = sshll.u32 %s2291_s26, 3 }
 0x1b3   : > { %1061 = vrot.lane.b32.xlu0 %v1053_v6, %s2259_s15 }
 0x1b5   : > { %1013 = vrot.lane.b32.xlu1 %v1010_v5, %s2261_s16  ;;  %s2284_s16 = smov 79  }
 0x1b9   : > { %1059 = vrot.lane.b32.xlu1 %v1056_v7, %s2259_s15 }
 0x1bd   : > { %1057 = vrot.lane.b32.xlu1 %v1052_v4, %s2259_s15  ;;  %s2283_s15 = smov 81  }
 0x1f2   : > { %v1016_v20 = vpop.permute.xlu0 %1015 }
 0x1f3   : > { %v855_v19 = vpop.permute.xlu1 %854 }
 0x1f6   : > { %v1035_v22 = vpop.permute.xlu0 %1034 }
 0x1f7   : > { %v1038_v23 = vsel %vm2263_vm0, %v1033_v12, %v1035_v22 }
 0x1f8   : > { %1042 = vst [vmem:[#allocation3 + $0x38] sm:$0xf0] %v1038_v23 }
 0x1fa   : > { %v874_v25 = vpop.permute.xlu0 %873 }
 0x1fb   : > { %v880_v28 = vsel %vm879_vm15, %v874_v25, %v876_v9 }
 0x1fc   : > { %884 = vst [vmem:[#allocation3] sm:$0xf0] %v880_v28 }
 0x1fe   : > { %v943_v30 = vpop.permute.xlu0 %942 }
 0x1ff   : > { %v946_v31 = vsel %vm944_vm3, %v941_v17, %v943_v30 }
 0x200   : > { %950 = vst [vmem:[#allocation3 + $0x18] sm:$0xf0] %v946_v31 }
 0x20f   : > { %v911_v21 = vpop.permute.xlu1 %910 }
 0x213   : > { %v959_v24 = vpop.permute.xlu1 %958 }
 0x214   : > { %v963_v26 = vsel %vm962_vm1, %v957_v14, %v959_v24  ;;  %v964_v27 = vsel %vm962_vm1, %v959_v24, %v961_v10  ;;  %v1070_v10 = vld [vmem:[%s2248_s7] sm:$0xff] }
 0x215   : > { %967 = vst [vmem:[#allocation3 + $0x20] sm:$0xf] %v963_v26  ;;  %968 = vst [vmem:[#allocation3 + $0x28] sm:$0xf] %v964_v27  ;;  %v989_v37 = vpop.permute.xlu0 %988 }
 0x217   : > { %v987_v29 = vpop.permute.xlu1 %986 }
 0x218   : > { %v992_v38 = vsel %vm990_vm4, %v987_v29, %v989_v37 }
 0x219   : > { %996 = vst [vmem:[#allocation3 + $0x28] sm:$0xf0] %v992_v38  ;;  %v939_v40 = vpop.permute.xlu0 %938 }
 0x21a   : > { %v945_v43 = vsel %vm944_vm3, %v939_v40, %v941_v17 }
 0x21b   : > { %v1012_v32 = vpop.permute.xlu1 %1011  ;;  %949 = vst [vmem:[#allocation3 + $0x10] sm:$0xf0] %v945_v43 }
 0x21d   : > { %v985_v45 = vpop.permute.xlu0 %984 }
 0x21e   : > { %v991_v48 = vsel %vm990_vm4, %v985_v45, %v987_v29 }
 0x21f   : > { %v857_v39 = vpop.permute.xlu1 %856  ;;  %995 = vst [vmem:[#allocation3 + $0x20] sm:$0xf0] %v991_v48 }
 0x220   : > { %v861_v41 = vsel %vm860_vm5, %v855_v19, %v857_v39  ;;  %v862_v42 = vsel %vm860_vm5, %v857_v39, %v859_v13  ;;  %v1076_v63 = vld [vmem:[#allocation3 + $0x28] sm:$0xff]  ;;  %v606_v13 = vld [vmem:[%s2245_s4] sm:$0xff] }
 0x221   : > { %865 = vst [vmem:[#allocation3] sm:$0xf] %v861_v41  ;;  %866 = vst [vmem:[#allocation3 + $0x8] sm:$0xf] %v862_v42  ;;  %v1031_v50 = vpop.permute.xlu0 %1030 }
 0x222   : > { %v1037_v53 = vsel %vm2263_vm0, %v1031_v50, %v1033_v12  ;;  %vm1087_vm0 = vcmask 293888   ;;  %v607_v12 = vld [vmem:[%s2245_s4 + $0x8] sm:$0xff]  ;;  %v735_v50 = vld [vmem:[%s2246_s5] sm:$0xff] }
 0x223   : > { %v913_v44 = vpop.permute.xlu1 %912  ;;  %1041 = vst [vmem:[#allocation3 + $0x30] sm:$0xf0] %v1037_v53 }
 0x224   : > { %v917_v46 = vsel %vm916_vm6, %v911_v21, %v913_v44  ;;  %v918_v47 = vsel %vm916_vm6, %v913_v44, %v915_v18  ;;  %v609_v18 = vld [vmem:[%s2245_s4 + $0x18] sm:$0xff] }
 0x225   : > { %921 = vst [vmem:[#allocation3 + $0x10] sm:$0xf] %v917_v46  ;;  %922 = vst [vmem:[#allocation3 + $0x18] sm:$0xf] %v918_v47  ;;  %v1062_v57 = vpop.permute.xlu0 %1061 }
 0x226   : > { %v1075_v0 = vld [vmem:[#allocation3 + $0x20] sm:$0xff] }
 0x227   : > { %v1014_v49 = vpop.permute.xlu1 %1013 }
 0x228   : > { %v1018_v51 = vsel %vm2258_vm7, %v1012_v32, %v1014_v49  ;;  %v1019_v52 = vsel %vm2258_vm7, %v1014_v49, %v1016_v20  ;;  %v1072_v54 = vld [vmem:[#allocation3 + $0x8] sm:$0xff]  ;;  %v1071_v55 = vld [vmem:[#allocation3] sm:$0xff]  ;;  %vm1091_vm7 = vcmask 1043456  }
 0x229   : > { %1022 = vst [vmem:[#allocation3 + $0x30] sm:$0xf] %v1018_v51  ;;  %1023 = vst [vmem:[#allocation3 + $0x38] sm:$0xf] %v1019_v52  ;;  %v608_v20 = vld [vmem:[%s2245_s4 + $0x10] sm:$0xff]  ;;  %v1081_v51 = vld [vmem:[%s2249_s8] sm:$0xff] }
 0x22a   : > { %1084 = vperm.xlu0 %1768, %v1081_v51  }
 0x22b   : > { %v1060_v56 = vpop.permute.xlu1 %1059 }
 0x22c   : > { %v1065_v58 = vsel %vm1063_vm14, %v1060_v56, %v1062_v57  ;;  %v1074_v59 = vld [vmem:[#allocation3 + $0x18] sm:$0xff]  ;;  %v1073_v60 = vld [vmem:[#allocation3 + $0x10] sm:$0xff] }
 0x22d   : > { %1069 = vst [vmem:[#allocation3 + $0x48] sm:$0xf] %v1065_v58  ;;  %v1716_v61 = vpack.c.bf16 %v1074_v59, %v1072_v54  ;;  %v1718_v62 = vpack.c.bf16 %v1073_v60, %v1071_v55 }
 0x22f   : > { %v1058_v1 = vpop.permute.xlu1 %1057  ;;  %1717 = vmatprep.subr.bf16.mxu1 %v1716_v61 }
 0x230   : > { %v1064_v3 = vsel %vm1063_vm14, %v1058_v1, %v1060_v56  ;;  %1719 = vmatpush1.bf16.msra.mxu1 %v1718_v62  ;;  %v1078_v4 = vld [vmem:[#allocation3 + $0x38] sm:$0xff]  ;;  %v1077_v5 = vld [vmem:[#allocation3 + $0x30] sm:$0xff] }
 0x231   : > { %1068 = vst [vmem:[#allocation3 + $0x40] sm:$0xf] %v1064_v3  ;;  %v1720_v6 = vpack.c.bf16 %v1078_v4, %v1076_v63  ;;  %v1722_v7 = vpack.c.bf16 %v1077_v5, %v1075_v0 }
 0x233   : > { %1721 = vmatprep.subr.bf16.mxu1 %v1720_v6 }
 0x234   : > { %1723 = vmatpush1.bf16.msra.mxu1 %v1722_v7  ;;  %v1080_v9 = vld [vmem:[#allocation3 + $0x48] sm:$0xf] }
 0x235   : > { %1624 = vmatprep.subr.msk.mxu1 %vm1091_vm7, %v1080_v9 }
 0x238   : > { %v1079_v11 = vld [vmem:[#allocation3 + $0x40] sm:$0xf] }
 0x239   : > { %1625 = vmatpush1.msk.msra.mxu1 %vm1091_vm7, %v1079_v11  ;;  %vm1204_vm7 = vcmask 1047808  }
 0x23a   : > { %1626 = vmatmul.mubr.msk.f32.vlgmr.msra.gmra.mrb[8].mxu1 %vm1087_vm0, %v1070_v10  ;;  %vm1192_vm0 = vcmask 523264  }
 0x23b   : > { %1193 = vst.msk [vmem:[#allocation4 + $0x10] sm:$0xff] %vm1192_vm0, %v1862_v2 }
 0x27a   : > { %v1679_v14 = vpop.f32.mrb[4].mxu1 }
 0x27b   : > { %v694_v15 = vadd.f32 %v1679_v14, %v607_v12  ;;  %v688_v16 = vpop.f32.mrb[5].mxu1 }
 0x27c   : > { %v689_v17 = vadd.f32 %v688_v16, %v606_v13 }
 0x27d   : > { %v1619_v19 = vmul.f32 -1.442695, %v694_v15 }
 0x27e   : > { %v1618_v21 = vmul.f32 -1.442695, %v689_v17  ;;  %v1682_v22 = vpop.f32.mrb[6].mxu1 }
 0x27f   : > { %1830 = vpow2.f32 %v1619_v19  ;;  %v704_v23 = vadd.f32 %v1682_v22, %v609_v18  ;;  %v698_v24 = vpop.f32.mrb[7].mxu1 }
 0x280   : > { %1832 = vpow2.f32 %v1618_v21  ;;  %v699_v25 = vadd.f32 %v698_v24, %v608_v20 }
 0x281   : > { %v1621_v26 = vmul.f32 -1.442695, %v704_v23 }
 0x282   : > { %v1620_v27 = vmul.f32 -1.442695, %v699_v25 }
 0x283   : > { %1834 = vpow2.f32 %v1621_v26 }
 0x284   : > { %1836 = vpow2.f32 %v1620_v27 }
 0x289   : > { %v1831_v28 = vpop.eup %1830 }
 0x28a   : > { %v1833_v29 = vpop.eup %1832  ;;  %v720_v30 = vadd.f32 1.0, %v1831_v28 }
 0x28b   : > { %v719_v31 = vadd.f32 1.0, %v1833_v29 }
 0x28c   : > { %1838 = vrcp.f32 %v720_v30 }
 0x28d   : > { %v1835_v32 = vpop.eup %1834  ;;  %1840 = vrcp.f32 %v719_v31 }
 0x28e   : > { %v1837_v37 = vpop.eup %1836  ;;  %v722_v38 = vadd.f32 1.0, %v1835_v32 }
 0x28f   : > { %v721_v39 = vadd.f32 1.0, %v1837_v37 }
 0x290   : > { %1842 = vrcp.f32 %v722_v38 }
 0x291   : > { %1844 = vrcp.f32 %v721_v39 }
 0x296   : > { %v1839_v40 = vpop.eup %1838 }
 0x297   : > { %v1841_v41 = vpop.eup %1840  ;;  %v732_v42 = vmul.f32 %v1839_v40, %v694_v15 }
 0x298   : > { %v731_v43 = vmul.f32 %v1841_v41, %v689_v17 }
 0x29a   : > { %v1843_v44 = vpop.eup %1842  ;;  %v1711_v45 = vpack.c.bf16 %v732_v42, %v731_v43 }
 0x29b   : > { %v1845_v46 = vpop.eup %1844  ;;  %v734_v47 = vmul.f32 %v1843_v44, %v704_v23 }
 0x29c   : > { %v733_v48 = vmul.f32 %v1845_v46, %v699_v25  ;;  %1712 = vmatpush3.bf16.msra.mxu0 %v1711_v45 }
 0x29d   : > { %1713 = vmatprep.subr.bf16.mxu0 %v1879_v8  ;;  %v736_v8 = vld [vmem:[%s2247_s6] sm:$0xff] }
 0x29e   : > { %v1714_v49 = vpack.c.bf16 %v734_v47, %v733_v48 }
 0x2a0   : > { %1715 = vmatpush3.bf16.msra.mxu0 %v1714_v49 }
 0x2a3   : > { %1692 = vmatmul.mubr.msk.f32.vlgmr.msra.gmra.mrb[0].mxu0 %vm476_vm2, %v735_v50 }
 0x2a4   : > { %1529 = vmatprep.mubr.f32.mxu0 %v1862_v2 }
 0x2a9   : > { %v1085_v57 = vpop.permute.xlu0 %1084 }
 0x30d   : > { %v1164_v52 = vpop.f32.mrb[8].mxu1 }
 0x30e   : > { %v1166_v53 = vpop.f32.mrb[9].mxu1  ;;  %v1165_v58 = vadd.f32 %v1164_v52, %v1085_v57 }
 0x30f   : > { %v1167_v59 = vadd.f32 %v1166_v53, %v1085_v57 }
 0x376   : > { %v806_v54 = vpop.f32.mrb[0].mxu0 }
 0x377   : > { %v807_v55 = vadd.f32 %v806_v54, %v736_v8  ;;  %v1693_v56 = vpop.f32.mrb[1].mxu0 }
 0x379   : > { %1171 = vperm.xlu1 %1769, %v807_v55   ;;  %v1455_v55 = vld [vmem:[%s2251_s10] sm:$0xf] }
 0x3f8   : > { %v1172_v60 = vpop.permute.xlu1 %1171 }
 0x3f9   : > { %v1174_v61 = vadd.f32 %v1172_v60, %v1165_v58  ;;  %v1175_v62 = vadd.f32 %v1172_v60, %v1167_v59 }
 0x3fb   : > { %v1627_v63 = vmul.f32 -1.442695, %v1174_v61  ;;  %v1628_v0 = vmul.f32 -1.442695, %v1175_v62 }
 0x3fd   : > { %1846 = vpow2.f32 %v1627_v63 }
 0x3fe   : > { %1848 = vpow2.f32 %v1628_v0 }
 0x407   : > { %v1847_v1 = vpop.eup %1846 }
 0x408   : > { %v1849_v3 = vpop.eup %1848  ;;  %v1182_v4 = vadd.f32 1.0, %v1847_v1 }
 0x409   : > { %v1183_v5 = vadd.f32 1.0, %v1849_v3 }
 0x40a   : > { %1850 = vrcp.f32 %v1182_v4 }
 0x40b   : > { %1852 = vrcp.f32 %v1183_v5 }
 0x414   : > { %v1851_v6 = vpop.eup %1850 }
 0x415   : > { %v1853_v7 = vpop.eup %1852  ;;  %v1188_v9 = vmul.f32 %v1851_v6, %v1174_v61 }
 0x416   : > { %v1189_v2 = vmul.f32 %v1853_v7, %v1175_v62 }
 0x417   : > { %1196 = vrot.lane.b32.xlu1 %v1188_v9, %s1863_s21 }
 0x418   : > { %1198 = vrot.lane.b32.xlu0 %v1189_v2, %s1863_s21  ;;  %s2276_s21 = smov 96  }
 0x41b   : > { %1211 = vrot.lane.b32.xlu1 %v2008_v33, %s1864_s22 }
 0x41c   : > { %1213 = vrot.lane.b32.xlu0 %v2010_v34, %s1864_s22  ;;  %s2277_s22 = smov 112  }
 0x41f   : > { %1258 = vrot.lane.b32.xlu1 %v2012_v35, %s1865_s23 }
 0x420   : > { %1260 = vrot.lane.b32.xlu0 %v2014_v36, %s1865_s23  ;;  %s2278_s23 = smov 113  }
 0x423   : > { %1287 = vrot.lane.b32.xlu1 %v2008_v33, %s1867_s27 }
 0x424   : > { %1289 = vrot.lane.b32.xlu0 %v2010_v34, %s1867_s27  ;;  %s2280_s27 = smov 111  }
 0x427   : > { %1334 = vrot.lane.b32.xlu1 %v2012_v35, %s1869_s29 }
 0x428   : > { %1336 = vrot.lane.b32.xlu0 %v2014_v36, %s1869_s29  ;;  %s2282_s29 = smov 80  }
 0x42b   : > { %1363 = vrot.lane.b32.xlu1 %v2008_v33, %s1866_s24 }
 0x42c   : > { %1365 = vrot.lane.b32.xlu0 %v2010_v34, %s1866_s24  ;;  %s2279_s24 = smov 97  }
 0x42f   : > { %1410 = vrot.lane.b32.xlu1 %v2012_v35, %s1868_s28 }
 0x430   : > { %1412 = vrot.lane.b32.xlu0 %v2014_v36, %s1868_s28  ;;  %s2281_s28 = smov 95  }
 0x489   : > { %v1197_v10 = vpop.permute.xlu1 %1196 }
 0x48a   : > { %v1199_v11 = vpop.permute.xlu0 %1198  ;;  %1205 = vst.msk [vmem:[#allocation4] sm:$0xff] %vm1204_vm7, %v1197_v10 }
 0x48b   : > { %1207 = vst.msk [vmem:[#allocation4 + $0x10] sm:$0xff] %vm476_vm2, %v1199_v11  ;;  %v1200_v12 = vsel %vm476_vm2, %v1197_v10, %v1199_v11  ;;  %vm2285_vm2 = vcmask 654336  }
 0x48d   : > { %v1212_v13 = vpop.permute.xlu1 %1211 }
 0x48e   : > { %v1214_v14 = vpop.permute.xlu0 %1213 }
 0x48f   : > { %v1215_v24 = vsel %vm845_vm9, %v1212_v13, %v1214_v14 }
 0x490   : > { %v1220_v31 = vmul.f32 %v1215_v24, %v1200_v12 }
 0x491   : > { %v1208_v33 = vld [vmem:[#allocation4] sm:$0xff]  ;;  %v1259_v15 = vpop.permute.xlu1 %1258 }
 0x492   : > { %v1210_v16 = vld [vmem:[#allocation4 + $0x10] sm:$0xff]  ;;  %v1261_v34 = vpop.permute.xlu0 %1260  ;;  %1319 = vrot.lane.b32.xlu1 %v1208_v33, %s2276_s21  ;;  %1243 = vrot.lane.b32.xlu0 %v1208_v33, %s2277_s22  ;;  %v1219_v18 = vmul.f32 %v1212_v13, %v1208_v33  ;;  %v1266_v25 = vmul.f32 %v1259_v15, %v1208_v33 }
 0x493   : > { %v1775_v35 = vpack.i.bf16 %v1210_v16, %v1200_v12  ;;  %v1221_v23 = vmul.f32 %v1214_v14, %v1210_v16  ;;  %v1262_v26 = vsel %vm901_vm10, %v1259_v15, %v1261_v34  ;;  %v1268_v32 = vmul.f32 %v1261_v34, %v1210_v16  ;;  %vm2288_vm10 = vmmov %vm2285_vm2 }
 0x494   : > { %v1267_v37 = vmul.f32 %v1262_v26, %v1200_v12 }
 0x495   : > { %v1288_v36 = vpop.permute.xlu1 %1287  ;;  %v1780_v40 = vpack.i.bf16 %v1221_v23, %v1220_v31 }
 0x496   : > { %v1290_v17 = vpop.permute.xlu0 %1289  ;;  %1776 = vrot.lane.b32.xlu1 %v1775_v35, %s2276_s21  ;;  %1771 = vrot.lane.b32.xlu0 %v1775_v35, %s2277_s22  ;;  %v1295_v19 = vmul.f32 %v1288_v36, %v1208_v33  ;;  %v1785_v44 = vpack.i.bf16 %v1268_v32, %v1267_v37  ;;  %s440_s22 = scalar_lea.vmem %s2254_s13, %s2289_s14 }
 0x497   : > { %v1291_v20 = vsel %vm928_vm8, %v1288_v36, %v1290_v17  ;;  %v1297_v27 = vmul.f32 %v1290_v17, %v1210_v16  ;;  %vm2286_vm8 = vcmask 662528  }
 0x498   : > { %v1296_v28 = vmul.f32 %v1291_v20, %v1200_v12  ;;  %vm2287_vm9 = vmmov %vm2286_vm8 }
 0x499   : > { %v1335_v21 = vpop.permute.xlu1 %1334 }
 0x49a   : > { %v1337_v22 = vpop.permute.xlu0 %1336  ;;  %1225 = vrot.lane.b32.xlu1 %v1219_v18, %s2278_s23  ;;  %1301 = vrot.lane.b32.xlu0 %v1295_v19, %s2279_s24  ;;  %v1342_v29 = vmul.f32 %v1335_v21, %v1208_v33  ;;  %v1790_v41 = vpack.i.bf16 %v1297_v27, %v1296_v28 }
 0x49b   : > { %v1338_v30 = vsel %vm974_vm11, %v1335_v21, %v1337_v22  ;;  %v1344_v38 = vmul.f32 %v1337_v22, %v1210_v16  ;;  %vm1461_vm11 = vcmask 588800  }
 0x49c   : > { %v1343_v39 = vmul.f32 %v1338_v30, %v1200_v12 }
 0x49d   : > { %v1364_v43 = vpop.permute.xlu1 %1363 }
 0x49e   : > { %1272 = vrot.lane.b32.xlu1 %v1266_v25, %s2280_s27  ;;  %1348 = vrot.lane.b32.xlu0 %v1342_v29, %s2281_s28  ;;  %v1366_v42 = vpop.permute.xlu0 %1365  ;;  %v1795_v45 = vpack.i.bf16 %v1344_v38, %v1343_v39  ;;  %v1371_v48 = vmul.f32 %v1364_v43, %v1208_v33 }
 0x49f   : > { %v1367_v46 = vsel %vm1002_vm12, %v1364_v43, %v1366_v42  ;;  %v1373_v47 = vmul.f32 %v1366_v42, %v1210_v16 }
 0x4a0   : > { %v1372_v49 = vmul.f32 %v1367_v46, %v1200_v12 }
 0x4a1   : > { %v1411_v51 = vpop.permute.xlu1 %1410 }
 0x4a2   : > { %1781 = vrot.lane.b32.xlu1 %v1780_v40, %s2278_s23  ;;  %1791 = vrot.lane.b32.xlu0 %v1790_v41, %s2279_s24  ;;  %v1413_v50 = vpop.permute.xlu0 %1412  ;;  %v1805_v52 = vpack.i.bf16 %v1373_v47, %v1372_v49  ;;  %v1418_v56 = vmul.f32 %v1411_v51, %v1208_v33 }
 0x4a3   : > { %v1414_v53 = vsel %vm1048_vm13, %v1411_v51, %v1413_v50  ;;  %v1420_v8 = vmul.f32 %v1413_v50, %v1210_v16 }
 0x4a4   : > { %v1419_v54 = vmul.f32 %v1414_v53, %v1200_v12 }
 0x4a6   : > { %1786 = vrot.lane.b32.xlu1 %v1785_v44, %s2280_s27  ;;  %1796 = vrot.lane.b32.xlu0 %v1795_v45, %s2281_s28 }
 0x4aa   : > { %1801 = vrot.lane.b32.xlu0 %v1775_v35, %s2282_s29  ;;  %1377 = vrot.lane.b32.xlu1 %v1371_v48, %s2283_s15 }
 0x4ae   : > { %1395 = vrot.lane.b32.xlu0 %v1208_v33, %s2282_s29  ;;  %1806 = vrot.lane.b32.xlu1 %v1805_v52, %s2283_s15 }
 0x4b2   : > { %1428 = vrot.lane.b32.xlu0 %v1420_v8, %s2284_s16  ;;  %1426 = vrot.lane.b32.xlu1 %v1419_v54, %s2284_s16  ;;  %v1436_v54 = vld [vmem:[%s2250_s9] sm:$0xf] }
 0x4b6   : > { %1458 = vperm.xlu0 %1768, %v1455_v55   ;;  %1424 = vrot.lane.b32.xlu1 %v1418_v56, %s2284_s16 }
 0x504   : > { %v1244_v57 = vpop.permute.xlu0 %1243  ;;  %v1320_v58 = vpop.permute.xlu1 %1319 }
 0x508   : > { %v1772_v59 = vpop.permute.xlu0 %1771  ;;  %v1777_v60 = vpop.permute.xlu1 %1776 }
 0x509   : > { %v1773_v1 = vunpack.i.l.bf16 %v1772_v59  ;;  %v1774_v3 = vunpack.i.h.bf16 %v1772_v59  ;;  %v1779_v14 = vunpack.i.h.bf16 %v1777_v60  ;;  %v1778_v33 = vunpack.i.l.bf16 %v1777_v60 }
 0x50b   : > { %v1249_v9 = vsel %vm879_vm15, %v1244_v57, %v1773_v1  ;;  %v1250_v13 = vsel %vm879_vm15, %v1773_v1, %v1774_v3  ;;  %v1326_v29 = vsel %vm962_vm1, %v1778_v33, %v1779_v14  ;;  %v1325_v38 = vsel %vm962_vm1, %v1320_v58, %v1778_v33 }
 0x50c   : > { %v1302_v61 = vpop.permute.xlu0 %1301  ;;  %v1226_v62 = vpop.permute.xlu1 %1225 }
 0x510   : > { %v1349_v63 = vpop.permute.xlu0 %1348  ;;  %v1273_v0 = vpop.permute.xlu1 %1272 }
 0x514   : > { %v1792_v4 = vpop.permute.xlu0 %1791  ;;  %v1782_v5 = vpop.permute.xlu1 %1781 }
 0x515   : > { %v1784_v6 = vunpack.i.h.bf16 %v1782_v5  ;;  %v1783_v7 = vunpack.i.l.bf16 %v1782_v5  ;;  %v1793_v2 = vunpack.i.l.bf16 %v1792_v4  ;;  %v1794_v10 = vunpack.i.h.bf16 %v1792_v4 }
 0x517   : > { %v1231_v11 = vsel %vm860_vm5, %v1226_v62, %v1783_v7  ;;  %v1232_v12 = vsel %vm860_vm5, %v1783_v7, %v1784_v6  ;;  %v1307_v20 = vsel %vm944_vm3, %v1302_v61, %v1793_v2  ;;  %v1308_v23 = vsel %vm944_vm3, %v1793_v2, %v1794_v10 }
 0x518   : > { %v1726_v15 = vpack.c.bf16 %v1249_v9, %v1231_v11  ;;  %v1797_v16 = vpop.permute.xlu0 %1796  ;;  %v1787_v34 = vpop.permute.xlu1 %1786  ;;  %v1724_v35 = vpack.c.bf16 %v1250_v13, %v1232_v12 }
 0x519   : > { %v1799_v36 = vunpack.i.h.bf16 %v1797_v16  ;;  %v1798_v17 = vunpack.i.l.bf16 %v1797_v16  ;;  %v1789_v18 = vunpack.i.h.bf16 %v1787_v34  ;;  %v1788_v19 = vunpack.i.l.bf16 %v1787_v34 }
 0x51a   : > { %1725 = vmatprep.subr.bf16.mxu0 %v1724_v35 }
 0x51b   : > { %v1278_v21 = vsel %vm916_vm6, %v1273_v0, %v1788_v19  ;;  %1727 = vmatpush1.bf16.msra.mxu0 %v1726_v15  ;;  %v1279_v22 = vsel %vm916_vm6, %v1788_v19, %v1789_v18  ;;  %v1355_v24 = vsel %vm990_vm4, %v1798_v17, %v1799_v36  ;;  %v1354_v30 = vsel %vm990_vm4, %v1349_v63, %v1798_v17 }
 0x51c   : > { %v1730_v25 = vpack.c.bf16 %v1307_v20, %v1278_v21  ;;  %v1802_v26 = vpop.permute.xlu0 %1801  ;;  %v1378_v27 = vpop.permute.xlu1 %1377  ;;  %v1728_v28 = vpack.c.bf16 %v1308_v23, %v1279_v22  ;;  %v1732_v31 = vpack.c.bf16 %v1355_v24, %v1326_v29  ;;  %v1734_v41 = vpack.c.bf16 %v1354_v30, %v1325_v38 }
 0x51d   : > { %v1804_v32 = vunpack.i.h.bf16 %v1802_v26  ;;  %v1803_v37 = vunpack.i.l.bf16 %v1802_v26 }
 0x51e   : > { %1729 = vmatprep.subr.bf16.mxu0 %v1728_v28 }
 0x51f   : > { %1731 = vmatpush1.bf16.msra.mxu0 %v1730_v25  ;;  %v1402_v47 = vsel %vm2288_vm10, %v1803_v37, %v1804_v32 }
 0x520   : > { %v1396_v39 = vpop.permute.xlu0 %1395  ;;  %v1807_v40 = vpop.permute.xlu1 %1806  ;;  %1733 = vmatprep.subr.bf16.mxu0 %v1732_v31 }
 0x521   : > { %v1809_v42 = vunpack.i.h.bf16 %v1807_v40  ;;  %v1808_v43 = vunpack.i.l.bf16 %v1807_v40  ;;  %v1401_v44 = vsel %vm2285_vm2, %v1396_v39, %v1803_v37 }
 0x523   : > { %v1383_v45 = vsel %vm2286_vm8, %v1378_v27, %v1808_v43  ;;  %1735 = vmatpush1.bf16.msra.mxu0 %v1734_v41  ;;  %v1384_v46 = vsel %vm2287_vm9, %v1808_v43, %v1809_v42 }
 0x524   : > { %v1738_v48 = vpack.c.bf16 %v1401_v44, %v1383_v45  ;;  %v1429_v49 = vpop.permute.xlu0 %1428  ;;  %v1427_v50 = vpop.permute.xlu1 %1426  ;;  %v1736_v51 = vpack.c.bf16 %v1402_v47, %v1384_v46 }
 0x525   : > { %v1431_v52 = vsel %vm1063_vm14, %v1427_v50, %v1429_v49 }
 0x526   : > { %1737 = vmatprep.subr.bf16.mxu0 %v1736_v51 }
 0x527   : > { %1739 = vmatpush1.bf16.msra.mxu0 %v1738_v48 }
 0x528   : > { %v1425_v53 = vpop.permute.xlu1 %1424  ;;  %1481 = vmatprep.subr.mxu0 %v1431_v52 }
 0x529   : > { %v1430_v8 = vsel %vm1063_vm14, %v1425_v53, %v1427_v50 }
 0x52b   : > { %1482 = vmatpush1.msra.mxu0 %v1430_v8 }
 0x52c   : > { %1629 = vmatmul.mubr.msk.f32.vlgmr.msra.gmra.mrb[2].mxu0 %vm1461_vm11, %v1436_v54 }
 0x535   : > { %v1459_v55 = vpop.permute.xlu0 %1458 }
 0x5ff   : > { %v1531_v56 = vpop.f32.mrb[2].mxu0 }
 0x600   : > { %v1532_v57 = vadd.f32 %v1531_v56, %v1459_v55  ;;  %v1533_v58 = vpop.f32.mrb[3].mxu0 }
 0x601   : > { %v1534_v59 = vadd.f32 %v1533_v58, %v1459_v55 }
 0x603   : > { %v1538_v60 = vcombine.low %v1532_v57, %v1534_v59 }
 0x605   : > { %1540 = vst [vmem:[%s440_s22] sm:$0xff] %v1538_v60 }
 0x606 PF: > { %s23_s25 = sadd.s32 1, %s1860_s25  }
 0x607   : > { %p20_p4 = scmp.ge.s32.totalorder %s23_s25, 4  }
 0x609   :  { %22 = sbr.rel (!%p20_p4) target bundleno = 1 (0x1), region = 103 }

</bundles_post_ra>
